<compile_context>
chip_gen: v7x
topology: tpu7x:2x2x1
jax: 0.10.0
libtpu: 0.0.40
codegen_flags: <defaults>
</compile_context>

<pallas_src>
import math
import functools

import jax
import jax.numpy as jnp
import numpy as np
from jax.experimental import pallas as pl
from jax.experimental.pallas import tpu as pltpu


def _round_up(n, m):
    return ((n + m - 1) // m) * m


# ----------------------------------------------------------------------------
# Kernel 1: embedding add (+pos +token_type) + LayerNorm(eps=1e-12)
# ----------------------------------------------------------------------------
def _emb_ln_kernel(eps):
    def kernel(x_ref, pos_ref, tt_ref, g_ref, b_ref, o_ref):
        y = x_ref[0] + pos_ref[...] + tt_ref[...]          # (S, D), broadcast in VMEM
        mean = jnp.mean(y, axis=-1, keepdims=True)
        var = jnp.mean((y - mean) ** 2, axis=-1, keepdims=True)
        o_ref[0] = (y - mean) * jax.lax.rsqrt(var + eps) * g_ref[...] + b_ref[...]
    return kernel


def emb_layernorm(tok_e, pos, tt, gamma, beta, eps):
    B, S, D = tok_e.shape
    return pl.pallas_call(
        _emb_ln_kernel(eps),
        out_shape=jax.ShapeDtypeStruct((B, S, D), jnp.float32),
        grid=(B,),
        in_specs=[
            pl.BlockSpec((1, S, D), lambda b: (b, 0, 0)),
            pl.BlockSpec((S, D), lambda b: (0, 0)),
            pl.BlockSpec((1, D), lambda b: (0, 0)),
            pl.BlockSpec((1, D), lambda b: (0, 0)),
            pl.BlockSpec((1, D), lambda b: (0, 0)),
        ],
        out_specs=pl.BlockSpec((1, S, D), lambda b: (b, 0, 0)),
        compiler_params=pltpu.CompilerParams(dimension_semantics=("parallel",)),
    )(tok_e, pos, tt, gamma, beta)


# ----------------------------------------------------------------------------
# Kernel 2: fused self-attention block (post-norm): y = LN(x + OutProj(MHA(x)))
# Heads-major weights: wq/wk/wv (H, D, hd), wout (H, hd, D).  The head loop is a
# static unroll using only leading-axis ref indexing; head outputs are folded
# straight into the output projection accumulator (no concatenate).
# ----------------------------------------------------------------------------
def _attn_kernel(num_heads, eps):
    def kernel(x_ref, wq_ref, wk_ref, wv_ref, bq_ref, bk_ref, bv_ref,
               wout_ref, bout_ref, g_ref, b_ref, o_ref):
        x = x_ref[0]                                        # (S, D) f32
        S, D = x.shape
        head_dim = wq_ref.shape[2]
        scale = 1.0 / math.sqrt(head_dim)
        xb = x.astype(jnp.bfloat16)

        acc = jnp.zeros((S, D), jnp.float32)                # out-proj accumulator
        for h in range(num_heads):                          # static unroll over heads
            qh = jnp.dot(xb, wq_ref[h], preferred_element_type=jnp.float32) + bq_ref[h]
            kh = jnp.dot(xb, wk_ref[h], preferred_element_type=jnp.float32) + bk_ref[h]
            vh = jnp.dot(xb, wv_ref[h], preferred_element_type=jnp.float32) + bv_ref[h]
            # scores = q @ k^T  (bf16 MXU, f32 accumulate)
            s = jax.lax.dot_general(
                qh.astype(jnp.bfloat16), kh.astype(jnp.bfloat16),
                (((1,), (1,)), ((), ())),
                preferred_element_type=jnp.float32) * scale          # (S, S)
            s = s - jnp.max(s, axis=-1, keepdims=True)
            e = jnp.exp(s)
            p = e * pl.reciprocal(jnp.sum(e, axis=-1, keepdims=True), approx=True)
            ah = jnp.dot(p.astype(jnp.bfloat16), vh.astype(jnp.bfloat16),
                         preferred_element_type=jnp.float32)         # (S, hd)
            # fold this head directly into the output projection
            acc = acc + jnp.dot(ah.astype(jnp.bfloat16), wout_ref[h],
                                preferred_element_type=jnp.float32)  # (S, D)

        y = x + acc + bout_ref[...]                          # residual
        mean = jnp.mean(y, axis=-1, keepdims=True)
        var = jnp.mean((y - mean) ** 2, axis=-1, keepdims=True)
        o_ref[0] = (y - mean) * jax.lax.rsqrt(var + eps) * g_ref[...] + b_ref[...]
    return kernel


def attn_block(x, lp, num_heads):
    B, S, D = x.shape
    H = num_heads
    hd = D // H
    return pl.pallas_call(
        _attn_kernel(num_heads, 1e-5),
        out_shape=jax.ShapeDtypeStruct((B, S, D), jnp.float32),
        grid=(B,),
        in_specs=[
            pl.BlockSpec((1, S, D), lambda b: (b, 0, 0)),
            pl.BlockSpec((H, D, hd), lambda b: (0, 0, 0)),
            pl.BlockSpec((H, D, hd), lambda b: (0, 0, 0)),
            pl.BlockSpec((H, D, hd), lambda b: (0, 0, 0)),
            pl.BlockSpec((H, 1, hd), lambda b: (0, 0, 0)),
            pl.BlockSpec((H, 1, hd), lambda b: (0, 0, 0)),
            pl.BlockSpec((H, 1, hd), lambda b: (0, 0, 0)),
            pl.BlockSpec((H, hd, D), lambda b: (0, 0, 0)),
            pl.BlockSpec((1, D), lambda b: (0, 0)),
            pl.BlockSpec((1, D), lambda b: (0, 0)),
            pl.BlockSpec((1, D), lambda b: (0, 0)),
        ],
        out_specs=pl.BlockSpec((1, S, D), lambda b: (b, 0, 0)),
        compiler_params=pltpu.CompilerParams(dimension_semantics=("parallel",)),
    )(x, lp["wq"], lp["wk"], lp["wv"], lp["bq"], lp["bk"], lp["bv"],
      lp["wout"], lp["bout"], lp["ln1_g"], lp["ln1_b"])


# ----------------------------------------------------------------------------
# Kernel 3: fused FFN block: y = LN(x + W2 @ gelu(W1 @ x + b1) + b2)
# Row-tiled over the flattened token axis; W1/W2 stay resident in VMEM.
# ----------------------------------------------------------------------------
def _ffn_kernel(eps):
    inv_sqrt2 = 0.7071067811865476

    def kernel(x_ref, w1_ref, b1_ref, w2_ref, b2_ref, g_ref, b_ref, o_ref):
        x = x_ref[...]                                       # (TL, D) f32
        h = jnp.dot(x.astype(jnp.bfloat16), w1_ref[...],
                    preferred_element_type=jnp.float32) + b1_ref[...]   # (TL, Dff)
        h = 0.5 * h * (1.0 + jax.lax.erf(h * inv_sqrt2))     # exact GELU, f32
        y = jnp.dot(h.astype(jnp.bfloat16), w2_ref[...],
                    preferred_element_type=jnp.float32) + b2_ref[...]   # (TL, D)
        y = x + y                                            # residual
        mean = jnp.mean(y, axis=-1, keepdims=True)
        var = jnp.mean((y - mean) ** 2, axis=-1, keepdims=True)
        o_ref[...] = (y - mean) * jax.lax.rsqrt(var + eps) * g_ref[...] + b_ref[...]
    return kernel


def ffn_block(x_flat, lp, row_tile=512):
    L, D = x_flat.shape
    Dff = lp["w1"].shape[1]
    TL = min(row_tile, _round_up(L, 8))       # rows per grid step (multiple of 8)
    Lp = _round_up(L, TL)
    if Lp != L:
        x_flat = jnp.pad(x_flat, ((0, Lp - L), (0, 0)))
    out = pl.pallas_call(
        _ffn_kernel(1e-5),
        out_shape=jax.ShapeDtypeStruct((Lp, D), jnp.float32),
        grid=(Lp // TL,),
        in_specs=[
            pl.BlockSpec((TL, D), lambda i: (i, 0)),
            pl.BlockSpec((D, Dff), lambda i: (0, 0)),   # weights resident across steps
            pl.BlockSpec((1, Dff), lambda i: (0, 0)),
            pl.BlockSpec((Dff, D), lambda i: (0, 0)),
            pl.BlockSpec((1, D), lambda i: (0, 0)),
            pl.BlockSpec((1, D), lambda i: (0, 0)),
            pl.BlockSpec((1, D), lambda i: (0, 0)),
        ],
        out_specs=pl.BlockSpec((TL, D), lambda i: (i, 0)),
        compiler_params=pltpu.CompilerParams(dimension_semantics=("parallel",)),
    )(x_flat, lp["w1"], lp["b1"], lp["w2"], lp["b2"], lp["ln2_g"], lp["ln2_b"])
    return out[:L]


# ----------------------------------------------------------------------------
# Parameter init (deterministic, synthetic — no checkpoint loading)
# Matmul weights stored in bf16 (MXU); biases / LN params / embeddings in f32.
# ----------------------------------------------------------------------------
def init_params(key, num_tokens, d_model, n_heads, n_layers, d_feed, max_len=512):
    hd = d_model // n_heads
    keys = iter(jax.random.split(key, 4 + 12 * n_layers))

    def nrm(shape, scale=0.02):
        return jax.random.normal(next(keys), shape, jnp.float32) * scale

    params = {
        "tok_emb": nrm((num_tokens, d_model)),
        "pos_emb": nrm((max_len, d_model)),
        "tt_emb": nrm((2, d_model)),
        "emb_ln_g": jnp.ones((1, d_model), jnp.float32),
        "emb_ln_b": jnp.zeros((1, d_model), jnp.float32),
        "layers": [],
    }
    for _ in range(n_layers):
        params["layers"].append(dict(
            wq=nrm((n_heads, d_model, hd)).astype(jnp.bfloat16),
            wk=nrm((n_heads, d_model, hd)).astype(jnp.bfloat16),
            wv=nrm((n_heads, d_model, hd)).astype(jnp.bfloat16),
            bq=nrm((n_heads, 1, hd)),
            bk=nrm((n_heads, 1, hd)),
            bv=nrm((n_heads, 1, hd)),
            wout=nrm((n_heads, hd, d_model)).astype(jnp.bfloat16),
            bout=nrm((1, d_model)),
            ln1_g=jnp.ones((1, d_model), jnp.float32),
            ln1_b=jnp.zeros((1, d_model), jnp.float32),
            w1=nrm((d_model, d_feed)).astype(jnp.bfloat16),
            b1=nrm((1, d_feed)),
            w2=nrm((d_feed, d_model)).astype(jnp.bfloat16),
            b2=nrm((1, d_model)),
            ln2_g=jnp.ones((1, d_model), jnp.float32),
            ln2_b=jnp.zeros((1, d_model), jnp.float32),
        ))
    return params


# ----------------------------------------------------------------------------
# MusicBertBase forward (Pallas for the hot paths, JAX for gather/concat glue)
# ----------------------------------------------------------------------------
CLS_ID = 101
SEP_ID = 102


@functools.partial(jax.jit, static_argnames=("num_heads",))
def music_bert_forward(params, src_tokens, *, num_heads):
    """src_tokens: (S, B) int32.  Returns (S+3, B, D) — CLS/SEP/SEP prepended."""
    S, B = src_tokens.shape
    D = params["tok_emb"].shape[1]

    # Embedding lookup (gather glue) in (B, S, D) layout; positional table stays
    # (S, D) and token-type 'text' stays (1, D) — broadcast happens inside VMEM.
    tok_e = jnp.take(params["tok_emb"], src_tokens.T, axis=0)        # (B, S, D)
    pos = params["pos_emb"][:S]                                      # (S, D)
    tt = params["tt_emb"][0:1]                                       # (1, D) 'text' ids == 0
    emb = emb_layernorm(tok_e, pos, tt,
                        params["emb_ln_g"], params["emb_ln_b"], 1e-12)

    # Special tokens: raw embeddings, no positional encoding (matches PyTorch code).
    cls = jnp.broadcast_to(params["tok_emb"][CLS_ID][None, None, :], (B, 1, D))
    sep = jnp.broadcast_to(params["tok_emb"][SEP_ID][None, None, :], (B, 1, D))
    # order: [CLS, src_sound(empty), SEP, src_sound2(empty), SEP, src_tokens]
    x = jnp.concatenate([cls, sep, sep, emb], axis=1)                # (B, S+3, D)

    Bt, St, _ = x.shape
    for lp in params["layers"]:
        x = attn_block(x, lp, num_heads)                             # fused MHA + LN1
        x = ffn_block(x.reshape(Bt * St, D), lp).reshape(Bt, St, D)  # fused FFN + LN2
    return jnp.transpose(x, (1, 0, 2))                               # (S+3, B, D)


# ----------------------------------------------------------------------------
# Pure-JAX reference (same math, same bf16 casting points) for correctness.
# ----------------------------------------------------------------------------
def _ln(x, g, b, eps):
    m = jnp.mean(x, axis=-1, keepdims=True)
    v = jnp.mean((x - m) ** 2, axis=-1, keepdims=True)
    return (x - m) / jnp.sqrt(v + eps) * g + b


def ref_forward(params, src_tokens, num_heads):
    f32, bf16 = jnp.float32, jnp.bfloat16
    S, B = src_tokens.shape
    D = params["tok_emb"].shape[1]
    tok_e = jnp.take(params["tok_emb"], src_tokens.T, axis=0)        # (B, S, D)
    add = params["pos_emb"][:S][None, :, :] + params["tt_emb"][0][None, None, :]
    emb = _ln(tok_e + add, params["emb_ln_g"][0], params["emb_ln_b"][0], 1e-12)
    cls = jnp.broadcast_to(params["tok_emb"][CLS_ID][None, None, :], (B, 1, D))
    sep = jnp.broadcast_to(params["tok_emb"][SEP_ID][None, None, :], (B, 1, D))
    x = jnp.concatenate([cls, sep, sep, emb], axis=1)                # (B, S+3, D)
    for lp in params["layers"]:
        xb = x.astype(bf16)
        q = jnp.einsum("bsd,hdc->bhsc", xb, lp["wq"], preferred_element_type=f32) + lp["bq"][None]
        k = jnp.einsum("bsd,hdc->bhsc", xb, lp["wk"], preferred_element_type=f32) + lp["bk"][None]
        v = jnp.einsum("bsd,hdc->bhsc", xb, lp["wv"], preferred_element_type=f32) + lp["bv"][None]
        hd = q.shape[-1]
        s = jnp.einsum("bhqc,bhkc->bhqk", q.astype(bf16), k.astype(bf16),
                       preferred_element_type=f32) / math.sqrt(hd)
        p = jax.nn.softmax(s, axis=-1)
        a = jnp.einsum("bhqk,bhkc->bhqc", p.astype(bf16), v.astype(bf16),
                       preferred_element_type=f32)
        proj = jnp.einsum("bhqc,hcd->bqd", a.astype(bf16), lp["wout"],
                          preferred_element_type=f32) + lp["bout"][0]
        x = _ln(x + proj, lp["ln1_g"][0], lp["ln1_b"][0], 1e-5)
        h = jnp.einsum("bqd,df->bqf", x.astype(bf16), lp["w1"],
                       preferred_element_type=f32) + lp["b1"][0]
        h = 0.5 * h * (1.0 + jax.lax.erf(h * 0.7071067811865476))
        y = jnp.einsum("bqf,fd->bqd", h.astype(bf16), lp["w2"],
                       preferred_element_type=f32) + lp["b2"][0]
        x = _ln(x + y, lp["ln2_g"][0], lp["ln2_b"][0], 1e-5)
    return jnp.transpose(x, (1, 0, 2))


# ----------------------------------------------------------------------------
if __name__ == "__main__":
    # Small configuration consistent with the module's constructor signature.
    NUM_TOKENS = 300        # vocab (must contain ids 101, 102)
    D_MODEL = 32
    N_HEAD = 4
    N_LAYERS = 2
    D_FEED = 64
    SEQ = 8
    BATCH = 2

    key = jax.random.PRNGKey(0)
    pkey, dkey = jax.random.split(key)
    params = init_params(pkey, NUM_TOKENS, D_MODEL, N_HEAD, N_LAYERS, D_FEED)

    src_tokens = jax.random.randint(dkey, (SEQ, BATCH), 0, NUM_TOKENS, dtype=jnp.int32)

    out = music_bert_forward(params, src_tokens, num_heads=N_HEAD)
    out = jax.block_until_ready(out)

    ref = jax.block_until_ready(ref_forward(params, src_tokens, N_HEAD))
    assert out.shape == (SEQ + 3, BATCH, D_MODEL), out.shape
    # bf16 matmuls + approx reciprocal in the softmax -> moderate tolerance.
    np.testing.assert_allclose(np.asarray(out), np.asarray(ref), rtol=1e-2, atol=1e-2)

    print("KERNEL_OK")
</pallas_src>

<mosaic_0001>
module attributes {stable_mosaic.version = 11 : i64} {
  func.func @kernel(%arg0: i32, %arg1: memref<1x8x32xf32, #tpu.memory_space<vmem>>, %arg2: memref<8x32xf32, #tpu.memory_space<vmem>>, %arg3: memref<1x32xf32, #tpu.memory_space<vmem>>, %arg4: memref<1x32xf32, #tpu.memory_space<vmem>>, %arg5: memref<1x32xf32, #tpu.memory_space<vmem>>, %arg6: memref<1x8x32xf32, #tpu.memory_space<vmem>>) attributes {dimension_semantics = [#tpu.dimension_semantics<parallel>], iteration_bounds = array<i64: 2>, scalar_prefetch = 0 : i64, scratch_operands = 0 : i64, tpu.core_type = #tpu.core_type<tc>, window_params = [{transform_indices = @transform_0, window_bounds = array<i64: 1, 8, 32>}, {pipeline_mode = #tpu.pipeline_mode<synchronous>, transform_indices = @transform_1, window_bounds = array<i64: 8, 32>}, {pipeline_mode = #tpu.pipeline_mode<synchronous>, transform_indices = @transform_2, window_bounds = array<i64: 1, 32>}, {pipeline_mode = #tpu.pipeline_mode<synchronous>, transform_indices = @transform_3, window_bounds = array<i64: 1, 32>}, {pipeline_mode = #tpu.pipeline_mode<synchronous>, transform_indices = @transform_4, window_bounds = array<i64: 1, 32>}, {transform_indices = @transform_5, window_bounds = array<i64: 1, 8, 32>}]} {
    %c0 = arith.constant 0 : index
    %c0_0 = arith.constant 0 : index
    %c0_1 = arith.constant 0 : index
    %0 = vector.load %arg1[%c0, %c0_0, %c0_1] : memref<1x8x32xf32, #tpu.memory_space<vmem>>, vector<1x8x32xf32>
    %1 = vector.shape_cast %0 : vector<1x8x32xf32> to vector<8x32xf32>
    %c0_2 = arith.constant 0 : index
    %c0_3 = arith.constant 0 : index
    %2 = vector.load %arg2[%c0_2, %c0_3] : memref<8x32xf32, #tpu.memory_space<vmem>>, vector<8x32xf32>
    %3 = arith.addf %1, %2 : vector<8x32xf32>
    %c0_4 = arith.constant 0 : index
    %c0_5 = arith.constant 0 : index
    %4 = vector.load %arg3[%c0_4, %c0_5] : memref<1x32xf32, #tpu.memory_space<vmem>>, vector<1x32xf32>
    %5 = vector.broadcast %4 : vector<1x32xf32> to vector<8x32xf32>
    %6 = arith.addf %3, %5 : vector<8x32xf32>
    %cst = arith.constant dense<0.000000e+00> : vector<8xf32>
    %7 = vector.multi_reduction <add>, %6, %cst [1] : vector<8x32xf32> to vector<8xf32>
    %8 = vector.shape_cast %7 : vector<8xf32> to vector<8x1xf32>
    %cst_6 = arith.constant 3.200000e+01 : f32
    %9 = vector.broadcast %cst_6 : f32 to vector<8x1xf32>
    %10 = arith.divf %8, %9 : vector<8x1xf32>
    %11 = vector.broadcast %10 : vector<8x1xf32> to vector<8x32xf32>
    %12 = arith.subf %6, %11 : vector<8x32xf32>
    %13 = arith.mulf %12, %12 : vector<8x32xf32>
    %cst_7 = arith.constant dense<0.000000e+00> : vector<8xf32>
    %14 = vector.multi_reduction <add>, %13, %cst_7 [1] : vector<8x32xf32> to vector<8xf32>
    %15 = vector.shape_cast %14 : vector<8xf32> to vector<8x1xf32>
    %cst_8 = arith.constant 3.200000e+01 : f32
    %16 = vector.broadcast %cst_8 : f32 to vector<8x1xf32>
    %17 = arith.divf %15, %16 : vector<8x1xf32>
    %18 = vector.broadcast %10 : vector<8x1xf32> to vector<8x32xf32>
    %19 = arith.subf %6, %18 : vector<8x32xf32>
    %cst_9 = arith.constant 9.99999996E-13 : f32
    %20 = vector.broadcast %cst_9 : f32 to vector<8x1xf32>
    %21 = arith.addf %17, %20 : vector<8x1xf32>
    %22 = math.rsqrt %21 : vector<8x1xf32>
    %23 = vector.broadcast %22 : vector<8x1xf32> to vector<8x32xf32>
    %24 = arith.mulf %19, %23 : vector<8x32xf32>
    %c0_10 = arith.constant 0 : index
    %c0_11 = arith.constant 0 : index
    %25 = vector.load %arg4[%c0_10, %c0_11] : memref<1x32xf32, #tpu.memory_space<vmem>>, vector<1x32xf32>
    %26 = vector.broadcast %25 : vector<1x32xf32> to vector<8x32xf32>
    %27 = arith.mulf %24, %26 : vector<8x32xf32>
    %c0_12 = arith.constant 0 : index
    %c0_13 = arith.constant 0 : index
    %28 = vector.load %arg5[%c0_12, %c0_13] : memref<1x32xf32, #tpu.memory_space<vmem>>, vector<1x32xf32>
    %29 = vector.broadcast %28 : vector<1x32xf32> to vector<8x32xf32>
    %30 = arith.addf %27, %29 : vector<8x32xf32>
    %c0_14 = arith.constant 0 : index
    %c0_15 = arith.constant 0 : index
    %c0_16 = arith.constant 0 : index
    %31 = vector.load %arg6[%c0_14, %c0_15, %c0_16] : memref<1x8x32xf32, #tpu.memory_space<vmem>>, vector<1x8x32xf32>
    %32 = vector.shape_cast %31 : vector<1x8x32xf32> to vector<8x32xf32>
    %33 = vector.shape_cast %30 : vector<8x32xf32> to vector<1x8x32xf32>
    tpu.vector_store %arg6[%c0_14, %c0_15, %c0_16], %33 {strides = array<i32>} : memref<1x8x32xf32, #tpu.memory_space<vmem>>, vector<1x8x32xf32>,
    return
  }
  func.func @transform_0(%arg0: i32) -> (i32, i32, i32) {
    %c0_i32 = arith.constant 0 : i32
    %c0_i32_0 = arith.constant 0 : i32
    %c0_i32_1 = arith.constant 0 : i32
    return %arg0, %c0_i32, %c0_i32_0 : i32, i32, i32
  }
  func.func @transform_1(%arg0: i32) -> (i32, i32) {
    %c0_i32 = arith.constant 0 : i32
    %c0_i32_0 = arith.constant 0 : i32
    %c0_i32_1 = arith.constant 0 : i32
    return %c0_i32, %c0_i32_0 : i32, i32
  }
  func.func @transform_2(%arg0: i32) -> (i32, i32) {
    %c0_i32 = arith.constant 0 : i32
    %c0_i32_0 = arith.constant 0 : i32
    %c0_i32_1 = arith.constant 0 : i32
    return %c0_i32, %c0_i32_0 : i32, i32
  }
  func.func @transform_3(%arg0: i32) -> (i32, i32) {
    %c0_i32 = arith.constant 0 : i32
    %c0_i32_0 = arith.constant 0 : i32
    %c0_i32_1 = arith.constant 0 : i32
    return %c0_i32, %c0_i32_0 : i32, i32
  }
  func.func @transform_4(%arg0: i32) -> (i32, i32) {
    %c0_i32 = arith.constant 0 : i32
    %c0_i32_0 = arith.constant 0 : i32
    %c0_i32_1 = arith.constant 0 : i32
    return %c0_i32, %c0_i32_0 : i32, i32
  }
  func.func @transform_5(%arg0: i32) -> (i32, i32, i32) {
    %c0_i32 = arith.constant 0 : i32
    %c0_i32_0 = arith.constant 0 : i32
    %c0_i32_1 = arith.constant 0 : i32
    return %arg0, %c0_i32, %c0_i32_0 : i32, i32, i32
  }
}

module attributes {stable_mosaic.version = 11 : i64} {
  func.func @kernel(%arg0: i32, %arg1: memref<1x11x32xf32, #tpu.memory_space<vmem>>, %arg2: memref<4x32x8xbf16, #tpu.memory_space<vmem>>, %arg3: memref<4x32x8xbf16, #tpu.memory_space<vmem>>, %arg4: memref<4x32x8xbf16, #tpu.memory_space<vmem>>, %arg5: memref<4x1x8xf32, #tpu.memory_space<vmem>>, %arg6: memref<4x1x8xf32, #tpu.memory_space<vmem>>, %arg7: memref<4x1x8xf32, #tpu.memory_space<vmem>>, %arg8: memref<4x8x32xbf16, #tpu.memory_space<vmem>>, %arg9: memref<1x32xf32, #tpu.memory_space<vmem>>, %arg10: memref<1x32xf32, #tpu.memory_space<vmem>>, %arg11: memref<1x32xf32, #tpu.memory_space<vmem>>, %arg12: memref<1x11x32xf32, #tpu.memory_space<vmem>>) attributes {dimension_semantics = [#tpu.dimension_semantics<parallel>], iteration_bounds = array<i64: 2>, scalar_prefetch = 0 : i64, scratch_operands = 0 : i64, tpu.core_type = #tpu.core_type<tc>, window_params = [{transform_indices = @transform_0, window_bounds = array<i64: 1, 11, 32>}, {pipeline_mode = #tpu.pipeline_mode<synchronous>, transform_indices = @transform_1, window_bounds = array<i64: 4, 32, 8>}, {pipeline_mode = #tpu.pipeline_mode<synchronous>, transform_indices = @transform_2, window_bounds = array<i64: 4, 32, 8>}, {pipeline_mode = #tpu.pipeline_mode<synchronous>, transform_indices = @transform_3, window_bounds = array<i64: 4, 32, 8>}, {pipeline_mode = #tpu.pipeline_mode<synchronous>, transform_indices = @transform_4, window_bounds = array<i64: 4, 1, 8>}, {pipeline_mode = #tpu.pipeline_mode<synchronous>, transform_indices = @transform_5, window_bounds = array<i64: 4, 1, 8>}, {pipeline_mode = #tpu.pipeline_mode<synchronous>, transform_indices = @transform_6, window_bounds = array<i64: 4, 1, 8>}, {pipeline_mode = #tpu.pipeline_mode<synchronous>, transform_indices = @transform_7, window_bounds = array<i64: 4, 8, 32>}, {pipeline_mode = #tpu.pipeline_mode<synchronous>, transform_indices = @transform_8, window_bounds = array<i64: 1, 32>}, {pipeline_mode = #tpu.pipeline_mode<synchronous>, transform_indices = @transform_9, window_bounds = array<i64: 1, 32>}, {pipeline_mode = #tpu.pipeline_mode<synchronous>, transform_indices = @transform_10, window_bounds = array<i64: 1, 32>}, {transform_indices = @transform_11, window_bounds = array<i64: 1, 11, 32>}]} {
    %c0 = arith.constant 0 : index
    %c0_0 = arith.constant 0 : index
    %c0_1 = arith.constant 0 : index
    %0 = vector.load %arg1[%c0, %c0_0, %c0_1] : memref<1x11x32xf32, #tpu.memory_space<vmem>>, vector<1x11x32xf32>
    %1 = vector.shape_cast %0 : vector<1x11x32xf32> to vector<11x32xf32>
    %2 = arith.truncf %1 : vector<11x32xf32> to vector<11x32xbf16>
    %cst = arith.constant 0.000000e+00 : f32
    %3 = vector.broadcast %cst : f32 to vector<11x32xf32>
    %c0_2 = arith.constant 0 : index
    %c0_3 = arith.constant 0 : index
    %c0_4 = arith.constant 0 : index
    %4 = vector.load %arg2[%c0_2, %c0_3, %c0_4] : memref<4x32x8xbf16, #tpu.memory_space<vmem>>, vector<1x32x8xbf16>
    %5 = vector.shape_cast %4 : vector<1x32x8xbf16> to vector<32x8xbf16>
    %cst_5 = arith.constant dense<0.000000e+00> : vector<11x8xf32>
    %6 = tpu.matmul %2, %5, %cst_5 {dimension_numbers = #tpu.dot_dimension_numbers<[1], [0], [0], [1], [0, 0, 1, 1], [], []>} : vector<11x32xbf16>, vector<32x8xbf16>, vector<11x8xf32> -> vector<11x8xf32>
    %c0_6 = arith.constant 0 : index
    %c0_7 = arith.constant 0 : index
    %c0_8 = arith.constant 0 : index
    %7 = vector.load %arg5[%c0_6, %c0_7, %c0_8] : memref<4x1x8xf32, #tpu.memory_space<vmem>>, vector<1x1x8xf32>
    %8 = vector.shape_cast %7 : vector<1x1x8xf32> to vector<1x8xf32>
    %9 = vector.broadcast %8 : vector<1x8xf32> to vector<11x8xf32>
    %10 = arith.addf %6, %9 : vector<11x8xf32>
    %c0_9 = arith.constant 0 : index
    %c0_10 = arith.constant 0 : index
    %c0_11 = arith.constant 0 : index
    %11 = vector.load %arg3[%c0_9, %c0_10, %c0_11] : memref<4x32x8xbf16, #tpu.memory_space<vmem>>, vector<1x32x8xbf16>
    %12 = vector.shape_cast %11 : vector<1x32x8xbf16> to vector<32x8xbf16>
    %cst_12 = arith.constant dense<0.000000e+00> : vector<11x8xf32>
    %13 = tpu.matmul %2, %12, %cst_12 {dimension_numbers = #tpu.dot_dimension_numbers<[1], [0], [0], [1], [0, 0, 1, 1], [], []>} : vector<11x32xbf16>, vector<32x8xbf16>, vector<11x8xf32> -> vector<11x8xf32>
    %c0_13 = arith.constant 0 : index
    %c0_14 = arith.constant 0 : index
    %c0_15 = arith.constant 0 : index
    %14 = vector.load %arg6[%c0_13, %c0_14, %c0_15] : memref<4x1x8xf32, #tpu.memory_space<vmem>>, vector<1x1x8xf32>
    %15 = vector.shape_cast %14 : vector<1x1x8xf32> to vector<1x8xf32>
    %16 = vector.broadcast %15 : vector<1x8xf32> to vector<11x8xf32>
    %17 = arith.addf %13, %16 : vector<11x8xf32>
    %c0_16 = arith.constant 0 : index
    %c0_17 = arith.constant 0 : index
    %c0_18 = arith.constant 0 : index
    %18 = vector.load %arg4[%c0_16, %c0_17, %c0_18] : memref<4x32x8xbf16, #tpu.memory_space<vmem>>, vector<1x32x8xbf16>
    %19 = vector.shape_cast %18 : vector<1x32x8xbf16> to vector<32x8xbf16>
    %cst_19 = arith.constant dense<0.000000e+00> : vector<11x8xf32>
    %20 = tpu.matmul %2, %19, %cst_19 {dimension_numbers = #tpu.dot_dimension_numbers<[1], [0], [0], [1], [0, 0, 1, 1], [], []>} : vector<11x32xbf16>, vector<32x8xbf16>, vector<11x8xf32> -> vector<11x8xf32>
    %c0_20 = arith.constant 0 : index
    %c0_21 = arith.constant 0 : index
    %c0_22 = arith.constant 0 : index
    %21 = vector.load %arg7[%c0_20, %c0_21, %c0_22] : memref<4x1x8xf32, #tpu.memory_space<vmem>>, vector<1x1x8xf32>
    %22 = vector.shape_cast %21 : vector<1x1x8xf32> to vector<1x8xf32>
    %23 = vector.broadcast %22 : vector<1x8xf32> to vector<11x8xf32>
    %24 = arith.addf %20, %23 : vector<11x8xf32>
    %25 = arith.truncf %10 : vector<11x8xf32> to vector<11x8xbf16>
    %26 = arith.truncf %17 : vector<11x8xf32> to vector<11x8xbf16>
    %cst_23 = arith.constant dense<0.000000e+00> : vector<11x11xf32>
    %27 = tpu.matmul %25, %26, %cst_23 {dimension_numbers = #tpu.dot_dimension_numbers<[1], [1], [0], [0], [0, 0, 1, 0], [], []>} : vector<11x8xbf16>, vector<11x8xbf16>, vector<11x11xf32> -> vector<11x11xf32>
    %cst_24 = arith.constant 0.353553385 : f32
    %28 = vector.broadcast %cst_24 : f32 to vector<11x11xf32>
    %29 = arith.mulf %27, %28 : vector<11x11xf32>
    %cst_25 = arith.constant dense<0xFF800000> : vector<11xf32>
    %30 = vector.multi_reduction <maximumf>, %29, %cst_25 [1] : vector<11x11xf32> to vector<11xf32>
    %31 = vector.shape_cast %30 : vector<11xf32> to vector<11x1xf32>
    %32 = vector.broadcast %31 : vector<11x1xf32> to vector<11x11xf32>
    %33 = arith.subf %29, %32 : vector<11x11xf32>
    %34 = math.exp %33 : vector<11x11xf32>
    %cst_26 = arith.constant dense<0.000000e+00> : vector<11xf32>
    %35 = vector.multi_reduction <add>, %34, %cst_26 [1] : vector<11x11xf32> to vector<11xf32>
    %36 = vector.shape_cast %35 : vector<11xf32> to vector<11x1xf32>
    %37 = tpu.reciprocal %36 {approx = true} : vector<11x1xf32> -> vector<11x1xf32>
    %38 = vector.broadcast %37 : vector<11x1xf32> to vector<11x11xf32>
    %39 = arith.mulf %34, %38 : vector<11x11xf32>
    %40 = arith.truncf %39 : vector<11x11xf32> to vector<11x11xbf16>
    %41 = arith.truncf %24 : vector<11x8xf32> to vector<11x8xbf16>
    %cst_27 = arith.constant dense<0.000000e+00> : vector<11x8xf32>
    %42 = tpu.matmul %40, %41, %cst_27 {dimension_numbers = #tpu.dot_dimension_numbers<[1], [0], [0], [1], [0, 0, 1, 1], [], []>} : vector<11x11xbf16>, vector<11x8xbf16>, vector<11x8xf32> -> vector<11x8xf32>
    %43 = arith.truncf %42 : vector<11x8xf32> to vector<11x8xbf16>
    %c0_28 = arith.constant 0 : index
    %c0_29 = arith.constant 0 : index
    %c0_30 = arith.constant 0 : index
    %44 = vector.load %arg8[%c0_28, %c0_29, %c0_30] : memref<4x8x32xbf16, #tpu.memory_space<vmem>>, vector<1x8x32xbf16>
    %45 = vector.shape_cast %44 : vector<1x8x32xbf16> to vector<8x32xbf16>
    %cst_31 = arith.constant dense<0.000000e+00> : vector<11x32xf32>
    %46 = tpu.matmul %43, %45, %cst_31 {dimension_numbers = #tpu.dot_dimension_numbers<[1], [0], [0], [1], [0, 0, 1, 1], [], []>} : vector<11x8xbf16>, vector<8x32xbf16>, vector<11x32xf32> -> vector<11x32xf32>
    %47 = arith.addf %3, %46 : vector<11x32xf32>
    %c1 = arith.constant 1 : index
    %c0_32 = arith.constant 0 : index
    %c0_33 = arith.constant 0 : index
    %48 = vector.load %arg2[%c1, %c0_32, %c0_33] : memref<4x32x8xbf16, #tpu.memory_space<vmem>>, vector<1x32x8xbf16>
    %49 = vector.shape_cast %48 : vector<1x32x8xbf16> to vector<32x8xbf16>
    %cst_34 = arith.constant dense<0.000000e+00> : vector<11x8xf32>
    %50 = tpu.matmul %2, %49, %cst_34 {dimension_numbers = #tpu.dot_dimension_numbers<[1], [0], [0], [1], [0, 0, 1, 1], [], []>} : vector<11x32xbf16>, vector<32x8xbf16>, vector<11x8xf32> -> vector<11x8xf32>
    %c1_35 = arith.constant 1 : index
    %c0_36 = arith.constant 0 : index
    %c0_37 = arith.constant 0 : index
    %51 = vector.load %arg5[%c1_35, %c0_36, %c0_37] : memref<4x1x8xf32, #tpu.memory_space<vmem>>, vector<1x1x8xf32>
    %52 = vector.shape_cast %51 : vector<1x1x8xf32> to vector<1x8xf32>
    %53 = vector.broadcast %52 : vector<1x8xf32> to vector<11x8xf32>
    %54 = arith.addf %50, %53 : vector<11x8xf32>
    %c1_38 = arith.constant 1 : index
    %c0_39 = arith.constant 0 : index
    %c0_40 = arith.constant 0 : index
    %55 = vector.load %arg3[%c1_38, %c0_39, %c0_40] : memref<4x32x8xbf16, #tpu.memory_space<vmem>>, vector<1x32x8xbf16>
    %56 = vector.shape_cast %55 : vector<1x32x8xbf16> to vector<32x8xbf16>
    %cst_41 = arith.constant dense<0.000000e+00> : vector<11x8xf32>
    %57 = tpu.matmul %2, %56, %cst_41 {dimension_numbers = #tpu.dot_dimension_numbers<[1], [0], [0], [1], [0, 0, 1, 1], [], []>} : vector<11x32xbf16>, vector<32x8xbf16>, vector<11x8xf32> -> vector<11x8xf32>
    %c1_42 = arith.constant 1 : index
    %c0_43 = arith.constant 0 : index
    %c0_44 = arith.constant 0 : index
    %58 = vector.load %arg6[%c1_42, %c0_43, %c0_44] : memref<4x1x8xf32, #tpu.memory_space<vmem>>, vector<1x1x8xf32>
    %59 = vector.shape_cast %58 : vector<1x1x8xf32> to vector<1x8xf32>
    %60 = vector.broadcast %59 : vector<1x8xf32> to vector<11x8xf32>
    %61 = arith.addf %57, %60 : vector<11x8xf32>
    %c1_45 = arith.constant 1 : index
    %c0_46 = arith.constant 0 : index
    %c0_47 = arith.constant 0 : index
    %62 = vector.load %arg4[%c1_45, %c0_46, %c0_47] : memref<4x32x8xbf16, #tpu.memory_space<vmem>>, vector<1x32x8xbf16>
    %63 = vector.shape_cast %62 : vector<1x32x8xbf16> to vector<32x8xbf16>
    %cst_48 = arith.constant dense<0.000000e+00> : vector<11x8xf32>
    %64 = tpu.matmul %2, %63, %cst_48 {dimension_numbers = #tpu.dot_dimension_numbers<[1], [0], [0], [1], [0, 0, 1, 1], [], []>} : vector<11x32xbf16>, vector<32x8xbf16>, vector<11x8xf32> -> vector<11x8xf32>
    %c1_49 = arith.constant 1 : index
    %c0_50 = arith.constant 0 : index
    %c0_51 = arith.constant 0 : index
    %65 = vector.load %arg7[%c1_49, %c0_50, %c0_51] : memref<4x1x8xf32, #tpu.memory_space<vmem>>, vector<1x1x8xf32>
    %66 = vector.shape_cast %65 : vector<1x1x8xf32> to vector<1x8xf32>
    %67 = vector.broadcast %66 : vector<1x8xf32> to vector<11x8xf32>
    %68 = arith.addf %64, %67 : vector<11x8xf32>
    %69 = arith.truncf %54 : vector<11x8xf32> to vector<11x8xbf16>
    %70 = arith.truncf %61 : vector<11x8xf32> to vector<11x8xbf16>
    %cst_52 = arith.constant dense<0.000000e+00> : vector<11x11xf32>
    %71 = tpu.matmul %69, %70, %cst_52 {dimension_numbers = #tpu.dot_dimension_numbers<[1], [1], [0], [0], [0, 0, 1, 0], [], []>} : vector<11x8xbf16>, vector<11x8xbf16>, vector<11x11xf32> -> vector<11x11xf32>
    %cst_53 = arith.constant 0.353553385 : f32
    %72 = vector.broadcast %cst_53 : f32 to vector<11x11xf32>
    %73 = arith.mulf %71, %72 : vector<11x11xf32>
    %cst_54 = arith.constant dense<0xFF800000> : vector<11xf32>
    %74 = vector.multi_reduction <maximumf>, %73, %cst_54 [1] : vector<11x11xf32> to vector<11xf32>
    %75 = vector.shape_cast %74 : vector<11xf32> to vector<11x1xf32>
    %76 = vector.broadcast %75 : vector<11x1xf32> to vector<11x11xf32>
    %77 = arith.subf %73, %76 : vector<11x11xf32>
    %78 = math.exp %77 : vector<11x11xf32>
    %cst_55 = arith.constant dense<0.000000e+00> : vector<11xf32>
    %79 = vector.multi_reduction <add>, %78, %cst_55 [1] : vector<11x11xf32> to vector<11xf32>
    %80 = vector.shape_cast %79 : vector<11xf32> to vector<11x1xf32>
    %81 = tpu.reciprocal %80 {approx = true} : vector<11x1xf32> -> vector<11x1xf32>
    %82 = vector.broadcast %81 : vector<11x1xf32> to vector<11x11xf32>
    %83 = arith.mulf %78, %82 : vector<11x11xf32>
    %84 = arith.truncf %83 : vector<11x11xf32> to vector<11x11xbf16>
    %85 = arith.truncf %68 : vector<11x8xf32> to vector<11x8xbf16>
    %cst_56 = arith.constant dense<0.000000e+00> : vector<11x8xf32>
    %86 = tpu.matmul %84, %85, %cst_56 {dimension_numbers = #tpu.dot_dimension_numbers<[1], [0], [0], [1], [0, 0, 1, 1], [], []>} : vector<11x11xbf16>, vector<11x8xbf16>, vector<11x8xf32> -> vector<11x8xf32>
    %87 = arith.truncf %86 : vector<11x8xf32> to vector<11x8xbf16>
    %c1_57 = arith.constant 1 : index
    %c0_58 = arith.constant 0 : index
    %c0_59 = arith.constant 0 : index
    %88 = vector.load %arg8[%c1_57, %c0_58, %c0_59] : memref<4x8x32xbf16, #tpu.memory_space<vmem>>, vector<1x8x32xbf16>
    %89 = vector.shape_cast %88 : vector<1x8x32xbf16> to vector<8x32xbf16>
    %cst_60 = arith.constant dense<0.000000e+00> : vector<11x32xf32>
    %90 = tpu.matmul %87, %89, %cst_60 {dimension_numbers = #tpu.dot_dimension_numbers<[1], [0], [0], [1], [0, 0, 1, 1], [], []>} : vector<11x8xbf16>, vector<8x32xbf16>, vector<11x32xf32> -> vector<11x32xf32>
    %91 = arith.addf %47, %90 : vector<11x32xf32>
    %c2 = arith.constant 2 : index
    %c0_61 = arith.constant 0 : index
    %c0_62 = arith.constant 0 : index
    %92 = vector.load %arg2[%c2, %c0_61, %c0_62] : memref<4x32x8xbf16, #tpu.memory_space<vmem>>, vector<1x32x8xbf16>
    %93 = vector.shape_cast %92 : vector<1x32x8xbf16> to vector<32x8xbf16>
    %cst_63 = arith.constant dense<0.000000e+00> : vector<11x8xf32>
    %94 = tpu.matmul %2, %93, %cst_63 {dimension_numbers = #tpu.dot_dimension_numbers<[1], [0], [0], [1], [0, 0, 1, 1], [], []>} : vector<11x32xbf16>, vector<32x8xbf16>, vector<11x8xf32> -> vector<11x8xf32>
    %c2_64 = arith.constant 2 : index
    %c0_65 = arith.constant 0 : index
    %c0_66 = arith.constant 0 : index
    %95 = vector.load %arg5[%c2_64, %c0_65, %c0_66] : memref<4x1x8xf32, #tpu.memory_space<vmem>>, vector<1x1x8xf32>
    %96 = vector.shape_cast %95 : vector<1x1x8xf32> to vector<1x8xf32>
    %97 = vector.broadcast %96 : vector<1x8xf32> to vector<11x8xf32>
    %98 = arith.addf %94, %97 : vector<11x8xf32>
    %c2_67 = arith.constant 2 : index
    %c0_68 = arith.constant 0 : index
    %c0_69 = arith.constant 0 : index
    %99 = vector.load %arg3[%c2_67, %c0_68, %c0_69] : memref<4x32x8xbf16, #tpu.memory_space<vmem>>, vector<1x32x8xbf16>
    %100 = vector.shape_cast %99 : vector<1x32x8xbf16> to vector<32x8xbf16>
    %cst_70 = arith.constant dense<0.000000e+00> : vector<11x8xf32>
    %101 = tpu.matmul %2, %100, %cst_70 {dimension_numbers = #tpu.dot_dimension_numbers<[1], [0], [0], [1], [0, 0, 1, 1], [], []>} : vector<11x32xbf16>, vector<32x8xbf16>, vector<11x8xf32> -> vector<11x8xf32>
    %c2_71 = arith.constant 2 : index
    %c0_72 = arith.constant 0 : index
    %c0_73 = arith.constant 0 : index
    %102 = vector.load %arg6[%c2_71, %c0_72, %c0_73] : memref<4x1x8xf32, #tpu.memory_space<vmem>>, vector<1x1x8xf32>
    %103 = vector.shape_cast %102 : vector<1x1x8xf32> to vector<1x8xf32>
    %104 = vector.broadcast %103 : vector<1x8xf32> to vector<11x8xf32>
    %105 = arith.addf %101, %104 : vector<11x8xf32>
    %c2_74 = arith.constant 2 : index
    %c0_75 = arith.constant 0 : index
    %c0_76 = arith.constant 0 : index
    %106 = vector.load %arg4[%c2_74, %c0_75, %c0_76] : memref<4x32x8xbf16, #tpu.memory_space<vmem>>, vector<1x32x8xbf16>
    %107 = vector.shape_cast %106 : vector<1x32x8xbf16> to vector<32x8xbf16>
    %cst_77 = arith.constant dense<0.000000e+00> : vector<11x8xf32>
    %108 = tpu.matmul %2, %107, %cst_77 {dimension_numbers = #tpu.dot_dimension_numbers<[1], [0], [0], [1], [0, 0, 1, 1], [], []>} : vector<11x32xbf16>, vector<32x8xbf16>, vector<11x8xf32> -> vector<11x8xf32>
    %c2_78 = arith.constant 2 : index
    %c0_79 = arith.constant 0 : index
    %c0_80 = arith.constant 0 : index
    %109 = vector.load %arg7[%c2_78, %c0_79, %c0_80] : memref<4x1x8xf32, #tpu.memory_space<vmem>>, vector<1x1x8xf32>
    %110 = vector.shape_cast %109 : vector<1x1x8xf32> to vector<1x8xf32>
    %111 = vector.broadcast %110 : vector<1x8xf32> to vector<11x8xf32>
    %112 = arith.addf %108, %111 : vector<11x8xf32>
    %113 = arith.truncf %98 : vector<11x8xf32> to vector<11x8xbf16>
    %114 = arith.truncf %105 : vector<11x8xf32> to vector<11x8xbf16>
    %cst_81 = arith.constant dense<0.000000e+00> : vector<11x11xf32>
    %115 = tpu.matmul %113, %114, %cst_81 {dimension_numbers = #tpu.dot_dimension_numbers<[1], [1], [0], [0], [0, 0, 1, 0], [], []>} : vector<11x8xbf16>, vector<11x8xbf16>, vector<11x11xf32> -> vector<11x11xf32>
    %cst_82 = arith.constant 0.353553385 : f32
    %116 = vector.broadcast %cst_82 : f32 to vector<11x11xf32>
    %117 = arith.mulf %115, %116 : vector<11x11xf32>
    %cst_83 = arith.constant dense<0xFF800000> : vector<11xf32>
    %118 = vector.multi_reduction <maximumf>, %117, %cst_83 [1] : vector<11x11xf32> to vector<11xf32>
    %119 = vector.shape_cast %118 : vector<11xf32> to vector<11x1xf32>
    %120 = vector.broadcast %119 : vector<11x1xf32> to vector<11x11xf32>
    %121 = arith.subf %117, %120 : vector<11x11xf32>
    %122 = math.exp %121 : vector<11x11xf32>
    %cst_84 = arith.constant dense<0.000000e+00> : vector<11xf32>
    %123 = vector.multi_reduction <add>, %122, %cst_84 [1] : vector<11x11xf32> to vector<11xf32>
    %124 = vector.shape_cast %123 : vector<11xf32> to vector<11x1xf32>
    %125 = tpu.reciprocal %124 {approx = true} : vector<11x1xf32> -> vector<11x1xf32>
    %126 = vector.broadcast %125 : vector<11x1xf32> to vector<11x11xf32>
    %127 = arith.mulf %122, %126 : vector<11x11xf32>
    %128 = arith.truncf %127 : vector<11x11xf32> to vector<11x11xbf16>
    %129 = arith.truncf %112 : vector<11x8xf32> to vector<11x8xbf16>
    %cst_85 = arith.constant dense<0.000000e+00> : vector<11x8xf32>
    %130 = tpu.matmul %128, %129, %cst_85 {dimension_numbers = #tpu.dot_dimension_numbers<[1], [0], [0], [1], [0, 0, 1, 1], [], []>} : vector<11x11xbf16>, vector<11x8xbf16>, vector<11x8xf32> -> vector<11x8xf32>
    %131 = arith.truncf %130 : vector<11x8xf32> to vector<11x8xbf16>
    %c2_86 = arith.constant 2 : index
    %c0_87 = arith.constant 0 : index
    %c0_88 = arith.constant 0 : index
    %132 = vector.load %arg8[%c2_86, %c0_87, %c0_88] : memref<4x8x32xbf16, #tpu.memory_space<vmem>>, vector<1x8x32xbf16>
    %133 = vector.shape_cast %132 : vector<1x8x32xbf16> to vector<8x32xbf16>
    %cst_89 = arith.constant dense<0.000000e+00> : vector<11x32xf32>
    %134 = tpu.matmul %131, %133, %cst_89 {dimension_numbers = #tpu.dot_dimension_numbers<[1], [0], [0], [1], [0, 0, 1, 1], [], []>} : vector<11x8xbf16>, vector<8x32xbf16>, vector<11x32xf32> -> vector<11x32xf32>
    %135 = arith.addf %91, %134 : vector<11x32xf32>
    %c3 = arith.constant 3 : index
    %c0_90 = arith.constant 0 : index
    %c0_91 = arith.constant 0 : index
    %136 = vector.load %arg2[%c3, %c0_90, %c0_91] : memref<4x32x8xbf16, #tpu.memory_space<vmem>>, vector<1x32x8xbf16>
    %137 = vector.shape_cast %136 : vector<1x32x8xbf16> to vector<32x8xbf16>
    %cst_92 = arith.constant dense<0.000000e+00> : vector<11x8xf32>
    %138 = tpu.matmul %2, %137, %cst_92 {dimension_numbers = #tpu.dot_dimension_numbers<[1], [0], [0], [1], [0, 0, 1, 1], [], []>} : vector<11x32xbf16>, vector<32x8xbf16>, vector<11x8xf32> -> vector<11x8xf32>
    %c3_93 = arith.constant 3 : index
    %c0_94 = arith.constant 0 : index
    %c0_95 = arith.constant 0 : index
    %139 = vector.load %arg5[%c3_93, %c0_94, %c0_95] : memref<4x1x8xf32, #tpu.memory_space<vmem>>, vector<1x1x8xf32>
    %140 = vector.shape_cast %139 : vector<1x1x8xf32> to vector<1x8xf32>
    %141 = vector.broadcast %140 : vector<1x8xf32> to vector<11x8xf32>
    %142 = arith.addf %138, %141 : vector<11x8xf32>
    %c3_96 = arith.constant 3 : index
    %c0_97 = arith.constant 0 : index
    %c0_98 = arith.constant 0 : index
    %143 = vector.load %arg3[%c3_96, %c0_97, %c0_98] : memref<4x32x8xbf16, #tpu.memory_space<vmem>>, vector<1x32x8xbf16>
    %144 = vector.shape_cast %143 : vector<1x32x8xbf16> to vector<32x8xbf16>
    %cst_99 = arith.constant dense<0.000000e+00> : vector<11x8xf32>
    %145 = tpu.matmul %2, %144, %cst_99 {dimension_numbers = #tpu.dot_dimension_numbers<[1], [0], [0], [1], [0, 0, 1, 1], [], []>} : vector<11x32xbf16>, vector<32x8xbf16>, vector<11x8xf32> -> vector<11x8xf32>
    %c3_100 = arith.constant 3 : index
    %c0_101 = arith.constant 0 : index
    %c0_102 = arith.constant 0 : index
    %146 = vector.load %arg6[%c3_100, %c0_101, %c0_102] : memref<4x1x8xf32, #tpu.memory_space<vmem>>, vector<1x1x8xf32>
    %147 = vector.shape_cast %146 : vector<1x1x8xf32> to vector<1x8xf32>
    %148 = vector.broadcast %147 : vector<1x8xf32> to vector<11x8xf32>
    %149 = arith.addf %145, %148 : vector<11x8xf32>
    %c3_103 = arith.constant 3 : index
    %c0_104 = arith.constant 0 : index
    %c0_105 = arith.constant 0 : index
    %150 = vector.load %arg4[%c3_103, %c0_104, %c0_105] : memref<4x32x8xbf16, #tpu.memory_space<vmem>>, vector<1x32x8xbf16>
    %151 = vector.shape_cast %150 : vector<1x32x8xbf16> to vector<32x8xbf16>
    %cst_106 = arith.constant dense<0.000000e+00> : vector<11x8xf32>
    %152 = tpu.matmul %2, %151, %cst_106 {dimension_numbers = #tpu.dot_dimension_numbers<[1], [0], [0], [1], [0, 0, 1, 1], [], []>} : vector<11x32xbf16>, vector<32x8xbf16>, vector<11x8xf32> -> vector<11x8xf32>
    %c3_107 = arith.constant 3 : index
    %c0_108 = arith.constant 0 : index
    %c0_109 = arith.constant 0 : index
    %153 = vector.load %arg7[%c3_107, %c0_108, %c0_109] : memref<4x1x8xf32, #tpu.memory_space<vmem>>, vector<1x1x8xf32>
    %154 = vector.shape_cast %153 : vector<1x1x8xf32> to vector<1x8xf32>
    %155 = vector.broadcast %154 : vector<1x8xf32> to vector<11x8xf32>
    %156 = arith.addf %152, %155 : vector<11x8xf32>
    %157 = arith.truncf %142 : vector<11x8xf32> to vector<11x8xbf16>
    %158 = arith.truncf %149 : vector<11x8xf32> to vector<11x8xbf16>
    %cst_110 = arith.constant dense<0.000000e+00> : vector<11x11xf32>
    %159 = tpu.matmul %157, %158, %cst_110 {dimension_numbers = #tpu.dot_dimension_numbers<[1], [1], [0], [0], [0, 0, 1, 0], [], []>} : vector<11x8xbf16>, vector<11x8xbf16>, vector<11x11xf32> -> vector<11x11xf32>
    %cst_111 = arith.constant 0.353553385 : f32
    %160 = vector.broadcast %cst_111 : f32 to vector<11x11xf32>
    %161 = arith.mulf %159, %160 : vector<11x11xf32>
    %cst_112 = arith.constant dense<0xFF800000> : vector<11xf32>
    %162 = vector.multi_reduction <maximumf>, %161, %cst_112 [1] : vector<11x11xf32> to vector<11xf32>
    %163 = vector.shape_cast %162 : vector<11xf32> to vector<11x1xf32>
    %164 = vector.broadcast %163 : vector<11x1xf32> to vector<11x11xf32>
    %165 = arith.subf %161, %164 : vector<11x11xf32>
    %166 = math.exp %165 : vector<11x11xf32>
    %cst_113 = arith.constant dense<0.000000e+00> : vector<11xf32>
    %167 = vector.multi_reduction <add>, %166, %cst_113 [1] : vector<11x11xf32> to vector<11xf32>
    %168 = vector.shape_cast %167 : vector<11xf32> to vector<11x1xf32>
    %169 = tpu.reciprocal %168 {approx = true} : vector<11x1xf32> -> vector<11x1xf32>
    %170 = vector.broadcast %169 : vector<11x1xf32> to vector<11x11xf32>
    %171 = arith.mulf %166, %170 : vector<11x11xf32>
    %172 = arith.truncf %171 : vector<11x11xf32> to vector<11x11xbf16>
    %173 = arith.truncf %156 : vector<11x8xf32> to vector<11x8xbf16>
    %cst_114 = arith.constant dense<0.000000e+00> : vector<11x8xf32>
    %174 = tpu.matmul %172, %173, %cst_114 {dimension_numbers = #tpu.dot_dimension_numbers<[1], [0], [0], [1], [0, 0, 1, 1], [], []>} : vector<11x11xbf16>, vector<11x8xbf16>, vector<11x8xf32> -> vector<11x8xf32>
    %175 = arith.truncf %174 : vector<11x8xf32> to vector<11x8xbf16>
    %c3_115 = arith.constant 3 : index
    %c0_116 = arith.constant 0 : index
    %c0_117 = arith.constant 0 : index
    %176 = vector.load %arg8[%c3_115, %c0_116, %c0_117] : memref<4x8x32xbf16, #tpu.memory_space<vmem>>, vector<1x8x32xbf16>
    %177 = vector.shape_cast %176 : vector<1x8x32xbf16> to vector<8x32xbf16>
    %cst_118 = arith.constant dense<0.000000e+00> : vector<11x32xf32>
    %178 = tpu.matmul %175, %177, %cst_118 {dimension_numbers = #tpu.dot_dimension_numbers<[1], [0], [0], [1], [0, 0, 1, 1], [], []>} : vector<11x8xbf16>, vector<8x32xbf16>, vector<11x32xf32> -> vector<11x32xf32>
    %179 = arith.addf %135, %178 : vector<11x32xf32>
    %180 = arith.addf %1, %179 : vector<11x32xf32>
    %c0_119 = arith.constant 0 : index
    %c0_120 = arith.constant 0 : index
    %181 = vector.load %arg9[%c0_119, %c0_120] : memref<1x32xf32, #tpu.memory_space<vmem>>, vector<1x32xf32>
    %182 = vector.broadcast %181 : vector<1x32xf32> to vector<11x32xf32>
    %183 = arith.addf %180, %182 : vector<11x32xf32>
    %cst_121 = arith.constant dense<0.000000e+00> : vector<11xf32>
    %184 = vector.multi_reduction <add>, %183, %cst_121 [1] : vector<11x32xf32> to vector<11xf32>
    %185 = vector.shape_cast %184 : vector<11xf32> to vector<11x1xf32>
    %cst_122 = arith.constant 3.200000e+01 : f32
    %186 = vector.broadcast %cst_122 : f32 to vector<11x1xf32>
    %187 = arith.divf %185, %186 : vector<11x1xf32>
    %188 = vector.broadcast %187 : vector<11x1xf32> to vector<11x32xf32>
    %189 = arith.subf %183, %188 : vector<11x32xf32>
    %190 = arith.mulf %189, %189 : vector<11x32xf32>
    %cst_123 = arith.constant dense<0.000000e+00> : vector<11xf32>
    %191 = vector.multi_reduction <add>, %190, %cst_123 [1] : vector<11x32xf32> to vector<11xf32>
    %192 = vector.shape_cast %191 : vector<11xf32> to vector<11x1xf32>
    %cst_124 = arith.constant 3.200000e+01 : f32
    %193 = vector.broadcast %cst_124 : f32 to vector<11x1xf32>
    %194 = arith.divf %192, %193 : vector<11x1xf32>
    %195 = vector.broadcast %187 : vector<11x1xf32> to vector<11x32xf32>
    %196 = arith.subf %183, %195 : vector<11x32xf32>
    %cst_125 = arith.constant 9.99999974E-6 : f32
    %197 = vector.broadcast %cst_125 : f32 to vector<11x1xf32>
    %198 = arith.addf %194, %197 : vector<11x1xf32>
    %199 = math.rsqrt %198 : vector<11x1xf32>
    %200 = vector.broadcast %199 : vector<11x1xf32> to vector<11x32xf32>
    %201 = arith.mulf %196, %200 : vector<11x32xf32>
    %c0_126 = arith.constant 0 : index
    %c0_127 = arith.constant 0 : index
    %202 = vector.load %arg10[%c0_126, %c0_127] : memref<1x32xf32, #tpu.memory_space<vmem>>, vector<1x32xf32>
    %203 = vector.broadcast %202 : vector<1x32xf32> to vector<11x32xf32>
    %204 = arith.mulf %201, %203 : vector<11x32xf32>
    %c0_128 = arith.constant 0 : index
    %c0_129 = arith.constant 0 : index
    %205 = vector.load %arg11[%c0_128, %c0_129] : memref<1x32xf32, #tpu.memory_space<vmem>>, vector<1x32xf32>
    %206 = vector.broadcast %205 : vector<1x32xf32> to vector<11x32xf32>
    %207 = arith.addf %204, %206 : vector<11x32xf32>
    %c0_130 = arith.constant 0 : index
    %c0_131 = arith.constant 0 : index
    %c0_132 = arith.constant 0 : index
    %208 = vector.load %arg12[%c0_130, %c0_131, %c0_132] : memref<1x11x32xf32, #tpu.memory_space<vmem>>, vector<1x11x32xf32>
    %209 = vector.shape_cast %208 : vector<1x11x32xf32> to vector<11x32xf32>
    %210 = vector.shape_cast %207 : vector<11x32xf32> to vector<1x11x32xf32>
    tpu.vector_store %arg12[%c0_130, %c0_131, %c0_132], %210 {strides = array<i32>} : memref<1x11x32xf32, #tpu.memory_space<vmem>>, vector<1x11x32xf32>,
    return
  }
  func.func @transform_0(%arg0: i32) -> (i32, i32, i32) {
    %c0_i32 = arith.constant 0 : i32
    %c0_i32_0 = arith.constant 0 : i32
    %c0_i32_1 = arith.constant 0 : i32
    return %arg0, %c0_i32, %c0_i32_0 : i32, i32, i32
  }
  func.func @transform_1(%arg0: i32) -> (i32, i32, i32) {
    %c0_i32 = arith.constant 0 : i32
    %c0_i32_0 = arith.constant 0 : i32
    %c0_i32_1 = arith.constant 0 : i32
    %c0_i32_2 = arith.constant 0 : i32
    return %c0_i32, %c0_i32_0, %c0_i32_1 : i32, i32, i32
  }
  func.func @transform_2(%arg0: i32) -> (i32, i32, i32) {
    %c0_i32 = arith.constant 0 : i32
    %c0_i32_0 = arith.constant 0 : i32
    %c0_i32_1 = arith.constant 0 : i32
    %c0_i32_2 = arith.constant 0 : i32
    return %c0_i32, %c0_i32_0, %c0_i32_1 : i32, i32, i32
  }
  func.func @transform_3(%arg0: i32) -> (i32, i32, i32) {
    %c0_i32 = arith.constant 0 : i32
    %c0_i32_0 = arith.constant 0 : i32
    %c0_i32_1 = arith.constant 0 : i32
    %c0_i32_2 = arith.constant 0 : i32
    return %c0_i32, %c0_i32_0, %c0_i32_1 : i32, i32, i32
  }
  func.func @transform_4(%arg0: i32) -> (i32, i32, i32) {
    %c0_i32 = arith.constant 0 : i32
    %c0_i32_0 = arith.constant 0 : i32
    %c0_i32_1 = arith.constant 0 : i32
    %c0_i32_2 = arith.constant 0 : i32
    return %c0_i32, %c0_i32_0, %c0_i32_1 : i32, i32, i32
  }
  func.func @transform_5(%arg0: i32) -> (i32, i32, i32) {
    %c0_i32 = arith.constant 0 : i32
    %c0_i32_0 = arith.constant 0 : i32
    %c0_i32_1 = arith.constant 0 : i32
    %c0_i32_2 = arith.constant 0 : i32
    return %c0_i32, %c0_i32_0, %c0_i32_1 : i32, i32, i32
  }
  func.func @transform_6(%arg0: i32) -> (i32, i32, i32) {
    %c0_i32 = arith.constant 0 : i32
    %c0_i32_0 = arith.constant 0 : i32
    %c0_i32_1 = arith.constant 0 : i32
    %c0_i32_2 = arith.constant 0 : i32
    return %c0_i32, %c0_i32_0, %c0_i32_1 : i32, i32, i32
  }
  func.func @transform_7(%arg0: i32) -> (i32, i32, i32) {
    %c0_i32 = arith.constant 0 : i32
    %c0_i32_0 = arith.constant 0 : i32
    %c0_i32_1 = arith.constant 0 : i32
    %c0_i32_2 = arith.constant 0 : i32
    return %c0_i32, %c0_i32_0, %c0_i32_1 : i32, i32, i32
  }
  func.func @transform_8(%arg0: i32) -> (i32, i32) {
    %c0_i32 = arith.constant 0 : i32
    %c0_i32_0 = arith.constant 0 : i32
    %c0_i32_1 = arith.constant 0 : i32
    return %c0_i32, %c0_i32_0 : i32, i32
  }
  func.func @transform_9(%arg0: i32) -> (i32, i32) {
    %c0_i32 = arith.constant 0 : i32
    %c0_i32_0 = arith.constant 0 : i32
    %c0_i32_1 = arith.constant 0 : i32
    return %c0_i32, %c0_i32_0 : i32, i32
  }
  func.func @transform_10(%arg0: i32) -> (i32, i32) {
    %c0_i32 = arith.constant 0 : i32
    %c0_i32_0 = arith.constant 0 : i32
    %c0_i32_1 = arith.constant 0 : i32
    return %c0_i32, %c0_i32_0 : i32, i32
  }
  func.func @transform_11(%arg0: i32) -> (i32, i32, i32) {
    %c0_i32 = arith.constant 0 : i32
    %c0_i32_0 = arith.constant 0 : i32
    %c0_i32_1 = arith.constant 0 : i32
    return %arg0, %c0_i32, %c0_i32_0 : i32, i32, i32
  }
}

module attributes {stable_mosaic.version = 11 : i64} {
  func.func @kernel(%arg0: i32, %arg1: memref<24x32xf32, #tpu.memory_space<vmem>>, %arg2: memref<32x64xbf16, #tpu.memory_space<vmem>>, %arg3: memref<1x64xf32, #tpu.memory_space<vmem>>, %arg4: memref<64x32xbf16, #tpu.memory_space<vmem>>, %arg5: memref<1x32xf32, #tpu.memory_space<vmem>>, %arg6: memref<1x32xf32, #tpu.memory_space<vmem>>, %arg7: memref<1x32xf32, #tpu.memory_space<vmem>>, %arg8: memref<24x32xf32, #tpu.memory_space<vmem>>) attributes {dimension_semantics = [#tpu.dimension_semantics<parallel>], iteration_bounds = array<i64: 1>, scalar_prefetch = 0 : i64, scratch_operands = 0 : i64, tpu.core_type = #tpu.core_type<tc>, window_params = [{transform_indices = @transform_0, window_bounds = array<i64: 24, 32>}, {pipeline_mode = #tpu.pipeline_mode<synchronous>, transform_indices = @transform_1, window_bounds = array<i64: 32, 64>}, {pipeline_mode = #tpu.pipeline_mode<synchronous>, transform_indices = @transform_2, window_bounds = array<i64: 1, 64>}, {pipeline_mode = #tpu.pipeline_mode<synchronous>, transform_indices = @transform_3, window_bounds = array<i64: 64, 32>}, {pipeline_mode = #tpu.pipeline_mode<synchronous>, transform_indices = @transform_4, window_bounds = array<i64: 1, 32>}, {pipeline_mode = #tpu.pipeline_mode<synchronous>, transform_indices = @transform_5, window_bounds = array<i64: 1, 32>}, {pipeline_mode = #tpu.pipeline_mode<synchronous>, transform_indices = @transform_6, window_bounds = array<i64: 1, 32>}, {transform_indices = @transform_7, window_bounds = array<i64: 24, 32>}]} {
    %c0 = arith.constant 0 : index
    %c0_0 = arith.constant 0 : index
    %0 = vector.load %arg1[%c0, %c0_0] : memref<24x32xf32, #tpu.memory_space<vmem>>, vector<24x32xf32>
    %1 = arith.truncf %0 : vector<24x32xf32> to vector<24x32xbf16>
    %c0_1 = arith.constant 0 : index
    %c0_2 = arith.constant 0 : index
    %2 = vector.load %arg2[%c0_1, %c0_2] : memref<32x64xbf16, #tpu.memory_space<vmem>>, vector<32x64xbf16>
    %cst = arith.constant dense<0.000000e+00> : vector<24x64xf32>
    %3 = tpu.matmul %1, %2, %cst {dimension_numbers = #tpu.dot_dimension_numbers<[1], [0], [0], [1], [0, 0, 1, 1], [], []>} : vector<24x32xbf16>, vector<32x64xbf16>, vector<24x64xf32> -> vector<24x64xf32>
    %c0_3 = arith.constant 0 : index
    %c0_4 = arith.constant 0 : index
    %4 = vector.load %arg3[%c0_3, %c0_4] : memref<1x64xf32, #tpu.memory_space<vmem>>, vector<1x64xf32>
    %5 = vector.broadcast %4 : vector<1x64xf32> to vector<24x64xf32>
    %6 = arith.addf %3, %5 : vector<24x64xf32>
    %cst_5 = arith.constant 5.000000e-01 : f32
    %7 = vector.broadcast %cst_5 : f32 to vector<24x64xf32>
    %8 = arith.mulf %7, %6 : vector<24x64xf32>
    %cst_6 = arith.constant 0.707106769 : f32
    %9 = vector.broadcast %cst_6 : f32 to vector<24x64xf32>
    %10 = arith.mulf %6, %9 : vector<24x64xf32>
    %11 = math.erf %10 : vector<24x64xf32>
    %cst_7 = arith.constant 1.000000e+00 : f32
    %12 = vector.broadcast %cst_7 : f32 to vector<24x64xf32>
    %13 = arith.addf %12, %11 : vector<24x64xf32>
    %14 = arith.mulf %8, %13 : vector<24x64xf32>
    %15 = arith.truncf %14 : vector<24x64xf32> to vector<24x64xbf16>
    %c0_8 = arith.constant 0 : index
    %c0_9 = arith.constant 0 : index
    %16 = vector.load %arg4[%c0_8, %c0_9] : memref<64x32xbf16, #tpu.memory_space<vmem>>, vector<64x32xbf16>
    %cst_10 = arith.constant dense<0.000000e+00> : vector<24x32xf32>
    %17 = tpu.matmul %15, %16, %cst_10 {dimension_numbers = #tpu.dot_dimension_numbers<[1], [0], [0], [1], [0, 0, 1, 1], [], []>} : vector<24x64xbf16>, vector<64x32xbf16>, vector<24x32xf32> -> vector<24x32xf32>
    %c0_11 = arith.constant 0 : index
    %c0_12 = arith.constant 0 : index
    %18 = vector.load %arg5[%c0_11, %c0_12] : memref<1x32xf32, #tpu.memory_space<vmem>>, vector<1x32xf32>
    %19 = vector.broadcast %18 : vector<1x32xf32> to vector<24x32xf32>
    %20 = arith.addf %17, %19 : vector<24x32xf32>
    %21 = arith.addf %0, %20 : vector<24x32xf32>
    %cst_13 = arith.constant dense<0.000000e+00> : vector<24xf32>
    %22 = vector.multi_reduction <add>, %21, %cst_13 [1] : vector<24x32xf32> to vector<24xf32>
    %23 = vector.shape_cast %22 : vector<24xf32> to vector<24x1xf32>
    %cst_14 = arith.constant 3.200000e+01 : f32
    %24 = vector.broadcast %cst_14 : f32 to vector<24x1xf32>
    %25 = arith.divf %23, %24 : vector<24x1xf32>
    %26 = vector.broadcast %25 : vector<24x1xf32> to vector<24x32xf32>
    %27 = arith.subf %21, %26 : vector<24x32xf32>
    %28 = arith.mulf %27, %27 : vector<24x32xf32>
    %cst_15 = arith.constant dense<0.000000e+00> : vector<24xf32>
    %29 = vector.multi_reduction <add>, %28, %cst_15 [1] : vector<24x32xf32> to vector<24xf32>
    %30 = vector.shape_cast %29 : vector<24xf32> to vector<24x1xf32>
    %cst_16 = arith.constant 3.200000e+01 : f32
    %31 = vector.broadcast %cst_16 : f32 to vector<24x1xf32>
    %32 = arith.divf %30, %31 : vector<24x1xf32>
    %33 = vector.broadcast %25 : vector<24x1xf32> to vector<24x32xf32>
    %34 = arith.subf %21, %33 : vector<24x32xf32>
    %cst_17 = arith.constant 9.99999974E-6 : f32
    %35 = vector.broadcast %cst_17 : f32 to vector<24x1xf32>
    %36 = arith.addf %32, %35 : vector<24x1xf32>
    %37 = math.rsqrt %36 : vector<24x1xf32>
    %38 = vector.broadcast %37 : vector<24x1xf32> to vector<24x32xf32>
    %39 = arith.mulf %34, %38 : vector<24x32xf32>
    %c0_18 = arith.constant 0 : index
    %c0_19 = arith.constant 0 : index
    %40 = vector.load %arg6[%c0_18, %c0_19] : memref<1x32xf32, #tpu.memory_space<vmem>>, vector<1x32xf32>
    %41 = vector.broadcast %40 : vector<1x32xf32> to vector<24x32xf32>
    %42 = arith.mulf %39, %41 : vector<24x32xf32>
    %c0_20 = arith.constant 0 : index
    %c0_21 = arith.constant 0 : index
    %43 = vector.load %arg7[%c0_20, %c0_21] : memref<1x32xf32, #tpu.memory_space<vmem>>, vector<1x32xf32>
    %44 = vector.broadcast %43 : vector<1x32xf32> to vector<24x32xf32>
    %45 = arith.addf %42, %44 : vector<24x32xf32>
    %c0_22 = arith.constant 0 : index
    %c0_23 = arith.constant 0 : index
    %46 = vector.load %arg8[%c0_22, %c0_23] : memref<24x32xf32, #tpu.memory_space<vmem>>, vector<24x32xf32>
    tpu.vector_store %arg8[%c0_22, %c0_23], %45 {strides = array<i32>} : memref<24x32xf32, #tpu.memory_space<vmem>>, vector<24x32xf32>,
    return
  }
  func.func @transform_0(%arg0: i32) -> (i32, i32) {
    %c0_i32 = arith.constant 0 : i32
    %c0_i32_0 = arith.constant 0 : i32
    return %arg0, %c0_i32 : i32, i32
  }
  func.func @transform_1(%arg0: i32) -> (i32, i32) {
    %c0_i32 = arith.constant 0 : i32
    %c0_i32_0 = arith.constant 0 : i32
    %c0_i32_1 = arith.constant 0 : i32
    return %c0_i32, %c0_i32_0 : i32, i32
  }
  func.func @transform_2(%arg0: i32) -> (i32, i32) {
    %c0_i32 = arith.constant 0 : i32
    %c0_i32_0 = arith.constant 0 : i32
    %c0_i32_1 = arith.constant 0 : i32
    return %c0_i32, %c0_i32_0 : i32, i32
  }
  func.func @transform_3(%arg0: i32) -> (i32, i32) {
    %c0_i32 = arith.constant 0 : i32
    %c0_i32_0 = arith.constant 0 : i32
    %c0_i32_1 = arith.constant 0 : i32
    return %c0_i32, %c0_i32_0 : i32, i32
  }
  func.func @transform_4(%arg0: i32) -> (i32, i32) {
    %c0_i32 = arith.constant 0 : i32
    %c0_i32_0 = arith.constant 0 : i32
    %c0_i32_1 = arith.constant 0 : i32
    return %c0_i32, %c0_i32_0 : i32, i32
  }
  func.func @transform_5(%arg0: i32) -> (i32, i32) {
    %c0_i32 = arith.constant 0 : i32
    %c0_i32_0 = arith.constant 0 : i32
    %c0_i32_1 = arith.constant 0 : i32
    return %c0_i32, %c0_i32_0 : i32, i32
  }
  func.func @transform_6(%arg0: i32) -> (i32, i32) {
    %c0_i32 = arith.constant 0 : i32
    %c0_i32_0 = arith.constant 0 : i32
    %c0_i32_1 = arith.constant 0 : i32
    return %c0_i32, %c0_i32_0 : i32, i32
  }
  func.func @transform_7(%arg0: i32) -> (i32, i32) {
    %c0_i32 = arith.constant 0 : i32
    %c0_i32_0 = arith.constant 0 : i32
    return %arg0, %c0_i32 : i32, i32
  }
}

</mosaic_0001>

<bundles_post_ra>
// kernel: music_bert_forward.5
= control target key start
LH: loop header
LB: loop body
LE: loop exit
PB: predicated region body
PF: predicated region fallthrough
CT: control target
= control target key end

     0   :  { %s376_s18 = smov 0   ;;  %s408_s0 = inlined_call_operand.vmem [shape: f32[2,8,32], index: 0, kind: input, shape index: {}]   ;;  %s409_s1 = inlined_call_operand.vmem [shape: f32[8,32], index: 1, kind: input, shape index: {}]   ;;  %s410_s2 = inlined_call_operand.vmem [shape: f32[1,32], index: 2, kind: input, shape index: {}]   ;;  %s411_s3 = inlined_call_operand.vmem [shape: f32[1,32], index: 3, kind: input, shape index: {}]   ;;  %s412_s4 = inlined_call_operand.vmem [shape: f32[1,32], index: 4, kind: input, shape index: {}]   ;;  %s413_s5 = inlined_call_operand.vmem [shape: f32[2,8,32], index: 5, kind: output, shape index: {}]  }
   0x1 LB: > { %s316_s19 = sadd.s32 4294967295, %s344_s18   ;;  %p320_p0 = scmp.ge.s32.totalorder %s344_s18, 1  ;;  %s344_s18 = sphi %s376_s18, %s15_s18  }
   0x2   : > { %p186_p1 = scmp.lt.s32.totalorder %s344_s18, 3 }
   0x4   : > { %p187_p2 = pnand %p320_p0, %p186_p1 }
   0x5   : > { %p212_p3 = scmp.lt.s32.totalorder (!%p187_p2), %s316_s19, 1  ;;  %v221_v0 = vld [vmem:[%s409_s1] sm:$0xff] (!%p187_p2)  ;;  %vm231_vm0 = vcmask (!%p187_p2), 261120  }
   0x6   : > { %190 = sbr.rel (%p187_p2) target bundleno = 335 (0x14f), region = 40  ;;  %v323_v2 = vld [vmem:[%s410_s2] ss:$0 sm:$0xff] (!%p187_p2) }
   0x7   : > { %v324_v15 = vld [vmem:[%s411_s3] ss:$0 sm:$0xff] (!%p187_p2) }
   0x8   : > { %v325_v17 = vld [vmem:[%s412_s4] ss:$0 sm:$0xff] (!%p187_p2) }
   0xd   : > { %s415_s19 = smov (!%p212_p3, %s316_s19), 1 }
   0xe   : > { %s321_s20 = sshll.u32 %s415_s19, 3 }
   0xf   : > { %s215_s25 = scalar_lea.vmem %s408_s0, %s321_s20  ;;  %s219_s9 = scalar_lea.vmem %s413_s5, %s321_s20 }
  0x10   : > { %v220_v1 = vld [vmem:[%s215_s25] sm:$0xff] }
  0x11   : > { %v222_v3 = vadd.f32 %v221_v0, %v220_v1 }
  0x13   : > { %v230_v4 = vadd.f32 %v323_v2, %v222_v3 }
  0x15   : > { %v232_v5 = vsel %vm231_vm0, %v230_v4, 0.0 }
  0x16   : > { %233 = vadd.xlane.f32.xlu0 %v232_v5 }
  0xa3   : > { %v234_v6 = vpop.xlane.xlu0 %233 }
  0xa4   : > { %v236_v7 = vmul.f32 0.03125, %v234_v6 }
  0xa6   : > { %v237_v8 = vsub.f32 %v230_v4, %v236_v7 }
  0xa8   : > { %v238_v9 = vmul.f32 %v237_v8, %v237_v8 }
  0xaa   : > { %v239_v10 = vsel %vm231_vm0, %v238_v9, 0.0 }
  0xab   : > { %240 = vadd.xlane.f32.xlu0 %v239_v10 }
 0x138   : > { %v241_v11 = vpop.xlane.xlu0 %240 }
 0x139   : > { %v242_v12 = vmul.f32 0.03125, %v241_v11 }
 0x13b   : > { %v243_v13 = vadd.f32 1e-12, %v242_v12 }
 0x13d   : > { %336 = vrsqrt.f32 %v243_v13 }
 0x147   : > { %v337_v14 = vpop.eup %336 }
 0x148   : > { %v245_v16 = vmul.f32 %v337_v14, %v237_v8 }
 0x14a   : > { %v253_v18 = vmul.f32 %v324_v15, %v245_v16 }
 0x14c   : > { %v261_v19 = vadd.f32 %v325_v17, %v253_v18 }
 0x14e   : > { %262 = vst.msk [vmem:[%s219_s9] sm:$0xff] %vm231_vm0, %v261_v19 }
 0x14f PF: > { %s15_s18 = sadd.s32 1, %s344_s18  }
 0x150   : > { %p12_p4 = scmp.ge.s32.totalorder %s15_s18, 4  }
 0x152   :  { %14 = sbr.rel (!%p12_p4) target bundleno = 1 (0x1), region = 70 }

// kernel: music_bert_forward.7
= control target key start
LH: loop header
LB: loop body
LE: loop exit
PB: predicated region body
PF: predicated region fallthrough
CT: control target
= control target key end

     0   :  { %vm55_vm0 = vcmask 261120   ;;  %vm166_vm1 = vcmask 523264   ;;  %s460_s1 = inlined_call_operand.vmem [shape: bf16[32,64], index: 1, kind: input, shape index: {}]   ;;  %s461_s0 = inlined_call_operand.vmem [shape: f32[24,32], index: 0, kind: input, shape index: {}]   ;;  %s462_s3 = inlined_call_operand.vmem [shape: bf16[64,32], index: 3, kind: input, shape index: {}]   ;;  %s463_s2 = inlined_call_operand.vmem [shape: f32[1,64], index: 2, kind: input, shape index: {}]   ;;  %s464_s4 = inlined_call_operand.vmem [shape: f32[1,32], index: 4, kind: input, shape index: {}]   ;;  %s465_s5 = inlined_call_operand.vmem [shape: f32[1,32], index: 5, kind: input, shape index: {}]   ;;  %s466_s6 = inlined_call_operand.vmem [shape: f32[1,32], index: 6, kind: input, shape index: {}]   ;;  %s467_s7 = inlined_call_operand.vmem [shape: f32[24,32], index: 7, kind: output, shape index: {}]  }
   0x1   :  { %v335_v0 = vld [vmem:[%s460_s1] sm:$0xff]   ;;  %v336_v1 = vld [vmem:[%s460_s1 + $0x8] sm:$0xff]   ;;  %v29_v4 = vld [vmem:[%s461_s0 + $0x10] sm:$0xff] }
   0x2   :  { %315 = vmatprep.subr.bf16.mxu0 %v335_v0  ;;  %v402_v2 = vld [vmem:[%s461_s0] sm:$0xff]  ;;  %v407_v3 = vld [vmem:[%s461_s0 + $0x8] sm:$0xff]  ;;  %v31_v6 = vpack.c.bf16 %v29_v4, %v29_v4  ;;  %v339_v9 = vld [vmem:[%s462_s3 + $0x10] sm:$0xff]  }
   0x3   :  { %316 = vmatpush3.bf16.msra.mxu0 %v335_v0  ;;  %v30_v5 = vpack.c.bf16 %v407_v3, %v402_v2  ;;  %v337_v7 = vld [vmem:[%s462_s3] sm:$0xff]   ;;  %v338_v8 = vld [vmem:[%s462_s3 + $0x8] sm:$0xff]   ;;  %v340_v10 = vld [vmem:[%s462_s3 + $0x18] sm:$0xff]  }
   0x4   :  { %317 = vmatprep.subr.bf16.mxu0 %v336_v1  ;;  %323 = vmatprep.subr.bf16.mxu1 %v337_v7  ;;  %v291_v11 = vld [vmem:[%s463_s2] ss:$0 sm:$0xff] }
   0x5   :  { %319 = vmatprep.mubr.msk.bf16.mxu0 %vm55_vm0, %v30_v5  ;;  %324 = vmatpush3.bf16.msra.mxu1 %v337_v7  ;;  %v296_v36 = vld [vmem:[%s464_s4] ss:$0 sm:$0xff] }
   0x6   :  { %325 = vmatprep.subr.bf16.mxu1 %v338_v8 }
   0x7   :  { %318 = vmatpush3.bf16.msra.mxu0 %v336_v1 }
   0x9   :  { %326 = vmatpush3.bf16.msra.mxu1 %v338_v8 }
   0xa   :  { %320 = vmatmul.mubr.msk.bf16.vlgmr.msra.gmra.mrb[0].mxu0 %vm55_vm0, %v31_v6  ;;  %327 = vmatprep.subr.bf16.mxu1 %v339_v9 }
   0xd   :  { %328 = vmatpush3.bf16.msra.mxu1 %v339_v9 }
   0xe   :  { %329 = vmatprep.subr.bf16.mxu1 %v340_v10 }
  0x11   :  { %330 = vmatpush3.bf16.msra.mxu1 %v340_v10 }
  0xdd   :  { %v321_v12 = vpop.f32.mrb[0].mxu0 }
  0xde   :  { %v105_v13 = vadd.f32 %v321_v12, %v291_v11  ;;  %v96_v14 = vpop.f32.mrb[1].mxu0 }
  0xdf   :  { %v97_v15 = vadd.f32 %v291_v11, %v96_v14  ;;  %v322_v16 = vpop.f32.mrb[2].mxu0 }
  0xe0   :  { %v115_v17 = vmul.f32 0.70710677, %v105_v13  ;;  %v99_v18 = vpop.f32.mrb[3].mxu0  ;;  %v112_v27 = vmul.f32 0.5, %v105_v13  ;;  %v304_v13 = vld [vmem:[%s466_s6] ss:$0 sm:$0xff] }
  0xe1   :  { %v113_v19 = vmul.f32 0.70710677, %v97_v15  ;;  %v100_v20 = vadd.f32 %v291_v11, %v99_v18  ;;  %v110_v28 = vmul.f32 0.5, %v97_v15  ;;  %v303_v11 = vld [vmem:[%s465_s5] ss:$0 sm:$0xff] }
  0xe2   :  { %341 = verf.f32 %v115_v17 }
  0xe3   :  { %343 = verf.f32 %v113_v19  ;;  %v114_v21 = vmul.f32 0.70710677, %v100_v20  ;;  %v111_v29 = vmul.f32 0.5, %v100_v20 }
  0xe5   :  { %345 = verf.f32 %v114_v21 }
  0xec   :  { %v342_v22 = vpop.eup %341 }
  0xed   :  { %v344_v23 = vpop.eup %343  ;;  %v121_v24 = vadd.f32 1.0, %v342_v22 }
  0xee   :  { %v119_v25 = vadd.f32 1.0, %v344_v23 }
  0xef   :  { %v346_v26 = vpop.eup %345  ;;  %v124_v31 = vmul.f32 %v121_v24, %v112_v27 }
  0xf0   :  { %v120_v30 = vadd.f32 1.0, %v346_v26  ;;  %v122_v32 = vmul.f32 %v119_v25, %v110_v28 }
  0xf1   :  { %v126_v35 = vpack.c.bf16 %v124_v31, %v124_v31 }
  0xf2   :  { %v123_v33 = vmul.f32 %v120_v30, %v111_v29 }
  0xf4   :  { %v125_v34 = vpack.c.bf16 %v123_v33, %v122_v32 }
  0xf6   :  { %331 = vmatprep.mubr.msk.bf16.mxu1 %vm166_vm1, %v125_v34 }
  0xf7   :  { %332 = vmatmul.mubr.msk.bf16.vlgmr.msra.gmra.mrb[0].mxu1 %vm166_vm1, %v126_v35 }
 0x1ca   :  { %v333_v37 = vpop.f32.mrb[0].mxu1 }
 0x1cb   :  { %v216_v38 = vadd.f32 %v333_v37, %v296_v36  ;;  %v207_v39 = vpop.f32.mrb[1].mxu1 }
 0x1cc   :  { %v208_v40 = vadd.f32 %v296_v36, %v207_v39  ;;  %v334_v41 = vpop.f32.mrb[2].mxu1 }
 0x1cd   :  { %v210_v42 = vpop.f32.mrb[3].mxu1  ;;  %v223_v43 = vadd.f32 %v216_v38, %v29_v4 }
 0x1ce   :  { %v211_v44 = vadd.f32 %v296_v36, %v210_v42  ;;  %v221_v45 = vadd.f32 %v208_v40, %v402_v2 }
 0x1cf   :  { %v230_v46 = vsel %vm55_vm0, %v223_v43, 0.0 }
 0x1d0   :  { %231 = vadd.xlane.f32.xlu1 %v230_v46  ;;  %v224_v47 = vsel %vm55_vm0, %v221_v45, 0.0  ;;  %v222_v48 = vadd.f32 %v211_v44, %v407_v3 }
 0x1d1   :  { %225 = vadd.xlane.f32.xlu0 %v224_v47 }
 0x1d2   :  { %v227_v49 = vsel %vm55_vm0, %v222_v48, 0.0 }
 0x1d5   :  { %228 = vadd.xlane.f32.xlu0 %v227_v49 }
 0x25d   :  { %v232_v50 = vpop.xlane.xlu1 %231 }
 0x25e   :  { %v236_v51 = vmul.f32 0.03125, %v232_v50  ;;  %v226_v52 = vpop.xlane.xlu0 %225 }
 0x25f   :  { %v234_v53 = vmul.f32 0.03125, %v226_v52 }
 0x260   :  { %v239_v54 = vsub.f32 %v223_v43, %v236_v51 }
 0x261   :  { %v237_v55 = vsub.f32 %v221_v45, %v234_v53 }
 0x262   :  { %v229_v56 = vpop.xlane.xlu0 %228  ;;  %v242_v61 = vmul.f32 %v239_v54, %v239_v54 }
 0x263   :  { %v235_v57 = vmul.f32 0.03125, %v229_v56  ;;  %v240_v58 = vmul.f32 %v237_v55, %v237_v55 }
 0x264   :  { %v249_v63 = vsel %vm55_vm0, %v242_v61, 0.0 }
 0x265   :  { %v238_v59 = vsub.f32 %v222_v48, %v235_v57  ;;  %v243_v60 = vsel %vm55_vm0, %v240_v58, 0.0 }
 0x266   :  { %244 = vadd.xlane.f32.xlu1 %v243_v60 }
 0x267   :  { %v241_v62 = vmul.f32 %v238_v59, %v238_v59 }
 0x269   :  { %v246_v0 = vsel %vm55_vm0, %v241_v62, 0.0 }
 0x26a   :  { %250 = vadd.xlane.f32.xlu1 %v249_v63  ;;  %247 = vadd.xlane.f32.xlu0 %v246_v0 }
 0x2f3   :  { %v245_v1 = vpop.xlane.xlu1 %244 }
 0x2f4   :  { %v252_v2 = vmul.f32 0.03125, %v245_v1 }
 0x2f6   :  { %v255_v3 = vadd.f32 1e-05, %v252_v2 }
 0x2f7   :  { %v251_v4 = vpop.xlane.xlu1 %250  ;;  %v248_v5 = vpop.xlane.xlu0 %247 }
 0x2f8   :  { %347 = vrsqrt.f32 %v255_v3  ;;  %v254_v6 = vmul.f32 0.03125, %v251_v4  ;;  %v253_v7 = vmul.f32 0.03125, %v248_v5 }
 0x2fa   :  { %v257_v8 = vadd.f32 1e-05, %v254_v6  ;;  %v256_v9 = vadd.f32 1e-05, %v253_v7 }
 0x2fc   :  { %349 = vrsqrt.f32 %v257_v8 }
 0x2fd   :  { %351 = vrsqrt.f32 %v256_v9 }
 0x302   :  { %v348_v10 = vpop.eup %347 }
 0x303   :  { %v261_v12 = vmul.f32 %v348_v10, %v237_v55 }
 0x305   :  { %v271_v14 = vmul.f32 %v303_v11, %v261_v12 }
 0x306   :  { %v350_v15 = vpop.eup %349 }
 0x307   :  { %v352_v16 = vpop.eup %351  ;;  %v281_v17 = vadd.f32 %v304_v13, %v271_v14  ;;  %v263_v18 = vmul.f32 %v350_v15, %v239_v54 }
 0x308   :  { %v262_v19 = vmul.f32 %v352_v16, %v238_v59 }
 0x309   :  { %284 = vst.msk [vmem:[%s467_s7] sm:$0xff] %vm55_vm0, %v281_v17  ;;  %v273_v20 = vmul.f32 %v303_v11, %v263_v18 }
 0x30a   :  { %v272_v21 = vmul.f32 %v303_v11, %v262_v19 }
 0x30b   :  { %v283_v22 = vadd.f32 %v304_v13, %v273_v20 }
 0x30c   :  { %v282_v23 = vadd.f32 %v304_v13, %v272_v21 }
 0x30d   :  { %286 = vst.msk [vmem:[%s467_s7 + $0x10] sm:$0xff] %vm55_vm0, %v283_v22 }
 0x30e   :  { %285 = vst.msk [vmem:[%s467_s7 + $0x8] sm:$0xff] %vm55_vm0, %v282_v23 }

// kernel: music_bert_forward.6
= control target key start
LH: loop header
LB: loop body
LE: loop exit
PB: predicated region body
PF: predicated region fallthrough
CT: control target
= control target key end

     0   :  { %s2488_s17 = smov 0   ;;  %s2828_s0 = inlined_call_operand.vmem [shape: f32[2,11,32], index: 0, kind: input, shape index: {}]   ;;  %s2829_s1 = inlined_call_operand.vmem [shape: bf16[4,32,8], index: 1, kind: input, shape index: {}]   ;;  %s2830_s2 = inlined_call_operand.vmem [shape: bf16[4,32,8], index: 2, kind: input, shape index: {}]   ;;  %s2831_s3 = inlined_call_operand.vmem [shape: bf16[4,32,8], index: 3, kind: input, shape index: {}]   ;;  %s2832_s4 = inlined_call_operand.vmem [shape: f32[4,1,8], index: 4, kind: input, shape index: {}]   ;;  %s2833_s5 = inlined_call_operand.vmem [shape: f32[4,1,8], index: 5, kind: input, shape index: {}]   ;;  %s2834_s6 = inlined_call_operand.vmem [shape: f32[4,1,8], index: 6, kind: input, shape index: {}]   ;;  %s2835_s7 = inlined_call_operand.vmem [shape: bf16[4,8,32], index: 7, kind: input, shape index: {}]   ;;  %s2836_s8 = inlined_call_operand.vmem [shape: f32[1,32], index: 8, kind: input, shape index: {}]   ;;  %s2837_s9 = inlined_call_operand.vmem [shape: f32[1,32], index: 9, kind: input, shape index: {}]   ;;  %s2838_s10 = inlined_call_operand.vmem [shape: f32[1,32], index: 10, kind: input, shape index: {}]   ;;  %s2839_s11 = inlined_call_operand.vmem [shape: f32[2,11,32], index: 11, kind: output, shape index: {}]  }
   0x1 LB: > { %s1994_s18 = sadd.s32 4294967295, %s2423_s17   ;;  %p1998_p0 = scmp.ge.s32.totalorder %s2423_s17, 1  ;;  %s2423_s17 = sphi %s2488_s17, %s21_s17  }
   0x2   : > { %p337_p1 = scmp.lt.s32.totalorder %s2423_s17, 3 }
   0x4   : > { %p338_p2 = pnand %p1998_p0, %p337_p1 }
   0x5   : > { %v2357_v0 = vld [vmem:[%s2830_s2] sm:$0xff] (!%p338_p2)   ;;  %v2425_v1 = vmov (!%p338_p2), 0.0   ;;  %v2358_v2 = vld [vmem:[%s2830_s2 + $0x8] sm:$0xff] (!%p338_p2)   ;;  %vm2426_vm0 = vmmov (!%p338_p2), 0   ;;  %p377_p3 = scmp.lt.s32.totalorder (!%p338_p2), %s1994_s18, 1  ;;  %vm414_vm1 = vcmask (!%p338_p2), 261120  }
   0x6   : > { %341 = sbr.rel (%p338_p2) target bundleno = 4251 (0x109b), region = 64  ;;  %2186 = vmatprep.subr.bf16.mxu1 (!%p338_p2), %v2425_v1  ;;  %2178 = vmatprep.subr.bf16.mxu0 (!%p338_p2), %v2425_v1  ;;  %v2359_v3 = vld [vmem:[%s2829_s1] sm:$0xff] (!%p338_p2)   ;;  %v2360_v4 = vld [vmem:[%s2829_s1 + $0x8] sm:$0xff] (!%p338_p2)   ;;  %vm589_vm2 = vcmask (!%p338_p2), 64512   ;;  %vm639_vm3 = vcmask (!%p338_p2), 89088   ;;  %vm643_vm4 = vcmask (!%p338_p2), 83968  }
   0x7   : > { %2187 = vmatpush3.bf16.msra.mxu1 (!%p338_p2), %v2357_v0  ;;  %2190 = vmatprep.mubr.msk.bf16.mxu1 (!%p338_p2), %vm2426_vm0, %v2425_v1  ;;  %v2003_v8 = vld [vmem:[%s2832_s4] ss:$0 sm:$0xff] (!%p338_p2)  ;;  %v2362_v26 = vld [vmem:[%s2831_s3 + $0x8] sm:$0xff] (!%p338_p2)   ;;  %vm668_vm5 = vcmask (!%p338_p2), 1044480   ;;  %vm669_vm6 = vcmask (!%p338_p2), 1045504   ;;  %v2427_v53 = vmov (!%p338_p2), 65535  }
   0x8   : > { %2188 = vmatprep.subr.bf16.mxu1 (!%p338_p2), %v2425_v1  ;;  %2182 = vmatprep.mubr.msk.bf16.mxu0 (!%p338_p2), %vm2426_vm0, %v2425_v1  ;;  %v2007_v9 = vld [vmem:[%s2833_s5] ss:$0 sm:$0xff] (!%p338_p2)  ;;  %v670_v54 = vsel (!%p338_p2), %vm668_vm5, 4294967295, %v2427_v53  ;;  %v2365_v57 = vld [vmem:[%s2829_s1 + $0x10] sm:$0xff] (!%p338_p2)   ;;  %v2366_v58 = vld [vmem:[%s2829_s1 + $0x18] sm:$0xff] (!%p338_p2)   ;;  %vm1044_vm7 = vcmask (!%p338_p2), 1043456  }
   0x9   : > { %2179 = vmatpush3.bf16.msra.mxu0 (!%p338_p2), %v2359_v3  ;;  %v2361_v25 = vld [vmem:[%s2831_s3] sm:$0xff] (!%p338_p2)   ;;  %v2572_v55 = vsel (!%p338_p2), %vm669_vm6, %v670_v54, 0  ;;  %vm1894_vm8 = vcmask (!%p338_p2), 256000  }
   0xa   : > { %2180 = vmatprep.subr.bf16.mxu0 (!%p338_p2), %v2425_v1  ;;  %v2011_v48 = vld [vmem:[%s2834_s6] ss:$0 sm:$0xff] (!%p338_p2) }
   0xb   : > { %2189 = vmatpush3.bf16.msra.mxu1 (!%p338_p2), %v2358_v2  ;;  %v2363_v2 = vld [vmem:[%s2830_s2 + $0x10] sm:$0xff] (!%p338_p2)  }
   0xc   : > { %2202 = vmatprep.subr.bf16.mxu1 (!%p338_p2), %v2425_v1 }
   0xd   : > { %s2841_s18 = smov (!%p377_p3, %s1994_s18), 1  ;;  %2181 = vmatpush3.bf16.msra.mxu0 %v2360_v4  ;;  %v2364_v4 = vld [vmem:[%s2830_s2 + $0x18] sm:$0xff]  }
   0xe   : > { %s2116_s27 = sshll.u32 %s2841_s18, 4  ;;  %2194 = vmatprep.subr.bf16.mxu0 %v2425_v1 }
   0xf   : > { %s381_s30 = scalar_lea.vmem %s2828_s0, %s2116_s27  ;;  %s386_s12 = scalar_lea.vmem %s2839_s11, %s2116_s27 }
  0x10   : > { %v2525_v5 = vld [vmem:[%s381_s30] sm:$0xff]  ;;  %v2527_v6 = vld [vmem:[%s381_s30 + $0x8] sm:$0x7] }
  0x11   : > { %v2531_v7 = vpack.c.bf16 %v2527_v6, %v2525_v5 }
  0x13   : > { %2191 = vmatmul.mubr.msk.bf16.vlgmr.msra.gmra.mrb[0].mxu1 %vm414_vm1, %v2531_v7  ;;  %2183 = vmatmul.mubr.msk.bf16.vlgmr.msra.gmra.mrb[0].mxu0 %vm414_vm1, %v2531_v7 }
  0x14   : > { %2204 = vmatprep.mubr.msk.bf16.mxu1 %vm2426_vm0, %v2425_v1  ;;  %2198 = vmatprep.mubr.msk.bf16.mxu0 %vm2426_vm0, %v2425_v1 }
  0x15   : > { %2195 = vmatpush3.bf16.msra.mxu0 %v2361_v25 }
  0x16   : > { %2196 = vmatprep.subr.bf16.mxu0 %v2425_v1 }
  0x19   : > { %2197 = vmatpush3.bf16.msra.mxu0 %v2362_v26 }
  0x1a   : > { %2208 = vmatprep.subr.bf16.mxu0 %v2425_v1 }
  0x1c   : > { %2199 = vmatmul.mubr.msk.bf16.vlgmr.msra.gmra.mrb[4].mxu0 %vm414_vm1, %v2531_v7 }
  0x1d   : > { %2210 = vmatprep.mubr.msk.bf16.mxu0 %vm2426_vm0, %v2425_v1 }
  0xe6   : > { %v516_v10 = vpop.f32.mrb[0].mxu1  ;;  %v452_v11 = vpop.f32.mrb[0].mxu0 }
  0xe7   : > { %v2192_v12 = vpop.f32.mrb[1].mxu1  ;;  %v453_v13 = vadd.f32 %v2003_v8, %v452_v11  ;;  %v2184_v14 = vpop.f32.mrb[1].mxu0  ;;  %v517_v17 = vadd.f32 %v2007_v9, %v516_v10 }
  0xe8   : > { %v519_v15 = vpop.f32.mrb[2].mxu1  ;;  %v455_v16 = vpop.f32.mrb[2].mxu0 }
  0xe9   : > { %v520_v18 = vadd.f32 %v2007_v9, %v519_v15  ;;  %v2193_v19 = vpop.f32.mrb[3].mxu1  ;;  %v456_v20 = vadd.f32 %v2003_v8, %v455_v16  ;;  %v2185_v21 = vpop.f32.mrb[3].mxu0  ;;  %v2022_v8 = vld [vmem:[%s2832_s4 + $0x1] ss:$0 sm:$0xff] }
  0xea   : > { %v2031_v21 = vld [vmem:[%s2833_s5 + $0x1] ss:$0 sm:$0xff] }
  0xeb   : > { %v588_v22 = vpack.c.bf16 %v520_v18, %v517_v17  ;;  %v587_v23 = vpack.c.bf16 %v456_v20, %v453_v13 }
  0xed   : > { %v594_v24 = vsel %vm589_vm2, %v588_v22, 0 }
  0xee   : > { %2203 = vmatpush3.bf16.xpose.msra.mxu1 %v594_v24 }
  0xef   : > { %2214 = vmatprep.subr.bf16.mxu1 %v2425_v1  ;;  %v580_v45 = vpop.f32.mrb[4].mxu0 }
  0xf0   : > { %v2200_v46 = vpop.f32.mrb[5].mxu0  ;;  %v581_v50 = vadd.f32 %v2011_v48, %v580_v45 }
  0xf1   : > { %v583_v47 = vpop.f32.mrb[6].mxu0 }
  0xf2   : > { %v2201_v49 = vpop.f32.mrb[7].mxu0  ;;  %v584_v51 = vadd.f32 %v2011_v48, %v583_v47 }
  0xf4   : > { %v664_v52 = vpack.c.bf16 %v584_v51, %v581_v50 }
  0xf5   : > { %2205 = vmatmul.mubr.msk.bf16.vlgmr.msra.gmra.mrb[4].mxu1 %vm589_vm2, %v587_v23 }
  0xf6   : > { %2218 = vmatprep.mubr.msk.bf16.mxu1 %vm2426_vm0, %v2425_v1  ;;  %v673_v56 = vand.u32 %v2572_v55, %v664_v52  ;;  %2215 = vmatpush3.bf16.msra.mxu1 %v2365_v57  ;;  %v2040_v52 = vld [vmem:[%s2834_s6 + $0x1] ss:$0 sm:$0xff] }
  0xf7   : > { %2216 = vmatprep.subr.bf16.mxu1 %v2425_v1 }
  0xf8   : > { %2209 = vmatpush3.bf16.msra.mxu0 %v673_v56 }
  0xf9   : > { %2222 = vmatprep.subr.bf16.mxu0 %v2425_v1 }
  0xfa   : > { %2217 = vmatpush3.bf16.msra.mxu1 %v2366_v58 }
  0xfb   : > { %2230 = vmatprep.subr.bf16.mxu1 %v2425_v1 }
  0xfd   : > { %2219 = vmatmul.mubr.msk.bf16.vlgmr.msra.gmra.mrb[8].mxu1 %vm414_vm1, %v2531_v7 }
  0xfe   : > { %2234 = vmatprep.mubr.msk.bf16.mxu1 %vm2426_vm0, %v2425_v1 }
 0x1c8   : > { %v630_v27 = vpop.f32.mrb[4].mxu1 }
 0x1c9   : > { %v637_v28 = vmul.f32 0.35355338, %v630_v27  ;;  %v2206_v29 = vpop.f32.mrb[5].mxu1 }
 0x1ca   : > { %v633_v30 = vpop.f32.mrb[6].mxu1 }
 0x1cb   : > { %v638_v31 = vmul.f32 0.35355338, %v633_v30  ;;  %v2207_v32 = vpop.f32.mrb[7].mxu1  ;;  %v640_v33 = vsel %vm639_vm3, %v637_v28, -inf  ;;  %v2367_v30 = vld [vmem:[%s2831_s3 + $0x10] sm:$0xff]  }
 0x1cc   : > { %641 = vmax.xlane.f32.xlu0 %v640_v33  ;;  %2231 = vmatpush3.bf16.msra.mxu1 %v2367_v30 }
 0x1cd   : > { %v644_v34 = vsel %vm643_vm4, %v638_v31, -inf  ;;  %2232 = vmatprep.subr.bf16.mxu1 %v2425_v1 }
 0x1d0   : > { %645 = vmax.xlane.f32.xlu0 %v644_v34  ;;  %v777_v9 = vpop.f32.mrb[8].mxu1 }
 0x1d1   : > { %v778_v10 = vadd.f32 %v2022_v8, %v777_v9  ;;  %v2220_v11 = vpop.f32.mrb[9].mxu1 }
 0x1d2   : > { %v780_v12 = vpop.f32.mrb[10].mxu1  ;;  %v2369_v11 = vld [vmem:[%s2830_s2 + $0x20] sm:$0xff]  }
 0x1d3   : > { %v781_v13 = vadd.f32 %v2022_v8, %v780_v12  ;;  %v2221_v14 = vpop.f32.mrb[11].mxu1  ;;  %v2370_v12 = vld [vmem:[%s2830_s2 + $0x28] sm:$0xff]  }
 0x1d5   : > { %v916_v15 = vpack.c.bf16 %v781_v13, %v778_v10 }
 0x259   : > { %v642_v35 = vpop.xlane.xlu0 %641 }
 0x25a   : > { %v647_v36 = vsub.f32 %v637_v28, %v642_v35 }
 0x25c   : > { %v649_v37 = vmul.f32 1.442695, %v647_v36 }
 0x25d   : > { %v646_v38 = vpop.xlane.xlu0 %645 }
 0x25e   : > { %2381 = vpow2.f32 %v649_v37  ;;  %v648_v39 = vsub.f32 %v638_v31, %v646_v38  ;;  %v2368_v31 = vld [vmem:[%s2831_s3 + $0x18] sm:$0xff]  }
 0x25f   : > { %2233 = vmatpush3.bf16.msra.mxu1 %v2368_v31 }
 0x260   : > { %v651_v40 = vmul.f32 1.442695, %v648_v39  ;;  %2244 = vmatprep.subr.bf16.mxu1 %v2425_v1 }
 0x262   : > { %2383 = vpow2.f32 %v651_v40  ;;  %2235 = vmatmul.mubr.msk.bf16.vlgmr.msra.gmra.mrb[12].mxu1 %vm414_vm1, %v2531_v7 }
 0x263   : > { %2246 = vmatprep.mubr.msk.bf16.mxu1 %vm2426_vm0, %v2425_v1 }
 0x268   : > { %v2382_v41 = vpop.eup %2381 }
 0x269   : > { %v653_v42 = vsel %vm639_vm3, %v2382_v41, 0.0 }
 0x26a   : > { %654 = vadd.xlane.f32.xlu1 %v653_v42 }
 0x26c   : > { %v2384_v43 = vpop.eup %2383 }
 0x26d   : > { %v656_v44 = vsel %vm643_vm4, %v2384_v43, 0.0 }
 0x26e   : > { %657 = vadd.xlane.f32.xlu1 %v656_v44 }
 0x2f7   : > { %v655_v59 = vpop.xlane.xlu1 %654 }
 0x2f8   : > { %2385 = vrcp.f32 %v655_v59 }
 0x2fb   : > { %v658_v60 = vpop.xlane.xlu1 %657 }
 0x2fc   : > { %2387 = vrcp.f32 %v658_v60  ;;  %v2046_v60 = vld [vmem:[%s2835_s7 + $0x4] sm:$0xf] }
 0x302   : > { %v2386_v61 = vpop.eup %2385 }
 0x303   : > { %v661_v63 = vmul.f32 %v2386_v61, %v2382_v41  ;;  %v1046_v61 = vsel %vm1044_vm7, %v2046_v60, 0 }
 0x306   : > { %v2388_v62 = vpop.eup %2387 }
 0x307   : > { %v662_v0 = vmul.f32 %v2388_v62, %v2384_v43 }
 0x309   : > { %v663_v3 = vpack.c.bf16 %v662_v0, %v661_v63 }
 0x30b   : > { %2211 = vmatmul.mubr.msk.bf16.vlgmr.msra.gmra.mrb[8].mxu0 %vm639_vm3, %v663_v3  ;;  %v717_v3 = vld [vmem:[%s2835_s7] sm:$0xf] }
 0x30c   : > { %2223 = vmatpush3.bf16.msra.mxu0 %v2363_v2  ;;  %2226 = vmatprep.mubr.msk.bf16.mxu0 %vm2426_vm0, %v2425_v1  ;;  %v1093_v10 = vsel %vm1044_vm7, %v717_v3, 0 }
 0x30d   : > { %2224 = vmatprep.subr.bf16.mxu0 %v2425_v1 }
 0x310   : > { %2225 = vmatpush3.bf16.msra.mxu0 %v2364_v4 }
 0x311   : > { %2238 = vmatprep.subr.bf16.mxu0 %v2425_v1 }
 0x313   : > { %2227 = vmatmul.mubr.msk.bf16.vlgmr.msra.gmra.mrb[12].mxu0 %vm414_vm1, %v2531_v7 }
 0x314   : > { %2240 = vmatprep.mubr.msk.bf16.mxu0 %vm2426_vm0, %v2425_v1 }
 0x335   : > { %v909_v40 = vpop.f32.mrb[12].mxu1 }
 0x336   : > { %v2236_v41 = vpop.f32.mrb[13].mxu1  ;;  %v910_v53 = vadd.f32 %v2040_v52, %v909_v40 }
 0x337   : > { %v912_v54 = vpop.f32.mrb[14].mxu1 }
 0x338   : > { %v2237_v56 = vpop.f32.mrb[15].mxu1  ;;  %v913_v57 = vadd.f32 %v2040_v52, %v912_v54 }
 0x33a   : > { %v990_v58 = vpack.c.bf16 %v913_v57, %v910_v53 }
 0x33c   : > { %v995_v59 = vand.u32 %v990_v58, %v2572_v55 }
 0x33e   : > { %2245 = vmatpush3.bf16.msra.mxu1 %v995_v59 }
 0x33f   : > { %2256 = vmatprep.subr.bf16.mxu1 %v2425_v1 }
 0x3de   : > { %v2606_v16 = vpop.f32.mrb[8].mxu0 }
 0x3df   : > { %v2212_v17 = vpop.f32.mrb[9].mxu0 }
 0x3e0   : > { %v2608_v18 = vpop.f32.mrb[10].mxu0 }
 0x3e1   : > { %v716_v19 = vpack.c.bf16 %v2608_v18, %v2606_v16  ;;  %v2213_v20 = vpop.f32.mrb[11].mxu0  ;;  %v2371_v16 = vld [vmem:[%s2829_s1 + $0x20] sm:$0xff]  }
 0x3e6   : > { %v843_v22 = vpop.f32.mrb[12].mxu0 }
 0x3e7   : > { %v2228_v23 = vpop.f32.mrb[13].mxu0  ;;  %v844_v25 = vadd.f32 %v2031_v21, %v843_v22 }
 0x3e8   : > { %v846_v24 = vpop.f32.mrb[14].mxu0 }
 0x3e9   : > { %v847_v26 = vadd.f32 %v2031_v21, %v846_v24  ;;  %v2229_v27 = vpop.f32.mrb[15].mxu0  ;;  %v2063_v24 = vld [vmem:[%s2833_s5 + $0x2] ss:$0 sm:$0xff] }
 0x3eb   : > { %v917_v28 = vpack.c.bf16 %v847_v26, %v844_v25 }
 0x3ed   : > { %v922_v29 = vsel %vm589_vm2, %v917_v28, 0 }
 0x3ee   : > { %2239 = vmatpush3.bf16.xpose.msra.mxu0 %v922_v29 }
 0x3ef   : > { %2250 = vmatprep.subr.bf16.mxu0 %v2425_v1 }
 0x3f5   : > { %2241 = vmatmul.mubr.msk.bf16.vlgmr.msra.gmra.mrb[16].mxu0 %vm589_vm2, %v916_v15 }
 0x3f6   : > { %2252 = vmatprep.mubr.msk.bf16.mxu0 %vm2426_vm0, %v2425_v1  ;;  %2251 = vmatpush3.bf16.msra.mxu0 %v1046_v61 }
 0x3f7   : > { %2262 = vmatprep.subr.bf16.mxu0 %v2425_v1 }
 0x4c8   : > { %v958_v32 = vpop.f32.mrb[16].mxu0 }
 0x4c9   : > { %v965_v33 = vmul.f32 0.35355338, %v958_v32  ;;  %v2242_v34 = vpop.f32.mrb[17].mxu0 }
 0x4ca   : > { %v961_v35 = vpop.f32.mrb[18].mxu0 }
 0x4cb   : > { %v966_v36 = vmul.f32 0.35355338, %v961_v35  ;;  %v2243_v37 = vpop.f32.mrb[19].mxu0  ;;  %v967_v38 = vsel %vm639_vm3, %v965_v33, -inf }
 0x4cc   : > { %968 = vmax.xlane.f32.xlu0 %v967_v38 }
 0x4cd   : > { %v970_v39 = vsel %vm643_vm4, %v966_v36, -inf }
 0x4ce   : > { %971 = vmax.xlane.f32.xlu1 %v970_v39  ;;  %v2054_v39 = vld [vmem:[%s2832_s4 + $0x2] ss:$0 sm:$0xff] }
 0x559   : > { %v969_v42 = vpop.xlane.xlu0 %968 }
 0x55a   : > { %v973_v43 = vsub.f32 %v965_v33, %v969_v42 }
 0x55b   : > { %v972_v44 = vpop.xlane.xlu1 %971 }
 0x55c   : > { %v975_v45 = vmul.f32 1.442695, %v973_v43  ;;  %v974_v46 = vsub.f32 %v966_v36, %v972_v44 }
 0x55e   : > { %2389 = vpow2.f32 %v975_v45  ;;  %v977_v47 = vmul.f32 1.442695, %v974_v46 }
 0x560   : > { %2391 = vpow2.f32 %v977_v47  ;;  %v2373_v47 = vld [vmem:[%s2831_s3 + $0x20] sm:$0xff]  }
 0x568   : > { %v2390_v48 = vpop.eup %2389 }
 0x569   : > { %v979_v49 = vsel %vm639_vm3, %v2390_v48, 0.0 }
 0x56a   : > { %v2392_v50 = vpop.eup %2391  ;;  %980 = vadd.xlane.f32.xlu0 %v979_v49 }
 0x56b   : > { %v982_v51 = vsel %vm643_vm4, %v2392_v50, 0.0 }
 0x56c   : > { %983 = vadd.xlane.f32.xlu1 %v982_v51 }
 0x5f7   : > { %v981_v62 = vpop.xlane.xlu0 %980 }
 0x5f8   : > { %2393 = vrcp.f32 %v981_v62 }
 0x5f9   : > { %v984_v63 = vpop.xlane.xlu1 %983 }
 0x5fa   : > { %2395 = vrcp.f32 %v984_v63 }
 0x602   : > { %v2394_v0 = vpop.eup %2393 }
 0x603   : > { %v987_v4 = vmul.f32 %v2394_v0, %v2390_v48  ;;  %v2374_v48 = vld [vmem:[%s2831_s3 + $0x28] sm:$0xff]  }
 0x604   : > { %v2396_v2 = vpop.eup %2395 }
 0x605   : > { %v988_v8 = vmul.f32 %v2396_v2, %v2392_v50 }
 0x607   : > { %v989_v9 = vpack.c.bf16 %v988_v8, %v987_v4 }
 0x609   : > { %2247 = vmatmul.mubr.msk.bf16.vlgmr.msra.gmra.mrb[16].mxu1 %vm639_vm3, %v989_v9 }
 0x60a   : > { %2257 = vmatpush3.bf16.msra.mxu1 %v1093_v10  ;;  %2258 = vmatprep.mubr.msk.bf16.mxu1 %vm2426_vm0, %v2425_v1  ;;  %v2072_v10 = vld [vmem:[%s2834_s6 + $0x2] ss:$0 sm:$0xff] }
 0x60b   : > { %2270 = vmatprep.subr.bf16.mxu1 %v2425_v1 }
 0x611   : > { %2259 = vmatmul.mubr.msk.bf16.vlgmr.msra.gmra.mrb[20].mxu1 %vm589_vm2, %v716_v19  ;;  %v2372_v19 = vld [vmem:[%s2829_s1 + $0x28] sm:$0xff]  }
 0x612   : > { %2271 = vmatpush3.bf16.msra.mxu1 %v2369_v11  ;;  %2274 = vmatprep.mubr.msk.bf16.mxu1 %vm2426_vm0, %v2425_v1 }
 0x613   : > { %2272 = vmatprep.subr.bf16.mxu1 %v2425_v1 }
 0x616   : > { %2273 = vmatpush3.bf16.msra.mxu1 %v2370_v12 }
 0x617   : > { %2286 = vmatprep.subr.bf16.mxu1 %v2425_v1 }
 0x619   : > { %2275 = vmatmul.mubr.msk.bf16.vlgmr.msra.gmra.mrb[24].mxu1 %vm414_vm1, %v2531_v7 }
 0x61a   : > { %2288 = vmatprep.mubr.msk.bf16.mxu1 %vm2426_vm0, %v2425_v1 }
 0x6dc   : > { %v1031_v13 = vpop.f32.mrb[16].mxu1 }
 0x6dd   : > { %v2248_v14 = vpop.f32.mrb[17].mxu1 }
 0x6de   : > { %v1034_v15 = vpop.f32.mrb[18].mxu1 }
 0x6df   : > { %v1038_v17 = vpack.c.bf16 %v1034_v15, %v1031_v13  ;;  %v2249_v18 = vpop.f32.mrb[19].mxu1 }
 0x6e1   : > { %2253 = vmatmul.mubr.msk.bf16.vlgmr.msra.gmra.mrb[20].mxu0 %vm589_vm2, %v1038_v17  ;;  %v2078_v17 = vld [vmem:[%s2835_s7 + $0x8] sm:$0xf] }
 0x6e2   : > { %2263 = vmatpush3.bf16.msra.mxu0 %v2371_v16  ;;  %2266 = vmatprep.mubr.msk.bf16.mxu0 %vm2426_vm0, %v2425_v1  ;;  %v1463_v18 = vsel %vm1044_vm7, %v2078_v17, 0 }
 0x6e3   : > { %2264 = vmatprep.subr.bf16.mxu0 %v2425_v1 }
 0x6e4   : > { %v1129_v20 = vpop.f32.mrb[20].mxu1 }
 0x6e5   : > { %v2260_v21 = vpop.f32.mrb[21].mxu1 }
 0x6e6   : > { %v1132_v22 = vpop.f32.mrb[22].mxu1  ;;  %2265 = vmatpush3.bf16.msra.mxu0 %v2372_v19 }
 0x6e7   : > { %v2261_v23 = vpop.f32.mrb[23].mxu1  ;;  %2278 = vmatprep.subr.bf16.mxu0 %v2425_v1 }
 0x6e9   : > { %2267 = vmatmul.mubr.msk.bf16.vlgmr.msra.gmra.mrb[24].mxu0 %vm414_vm1, %v2531_v7 }
 0x6ea   : > { %2282 = vmatprep.mubr.msk.bf16.mxu0 %vm2426_vm0, %v2425_v1  ;;  %2279 = vmatpush3.bf16.msra.mxu0 %v2373_v47 }
 0x6eb   : > { %2280 = vmatprep.subr.bf16.mxu0 %v2425_v1 }
 0x6ec   : > { %v1261_v25 = vpop.f32.mrb[24].mxu1 }
 0x6ed   : > { %v1262_v26 = vadd.f32 %v2063_v24, %v1261_v25  ;;  %v2276_v27 = vpop.f32.mrb[25].mxu1 }
 0x6ee   : > { %v1264_v28 = vpop.f32.mrb[26].mxu1  ;;  %2281 = vmatpush3.bf16.msra.mxu0 %v2374_v48  ;;  %v2378_v27 = vld [vmem:[%s2829_s1 + $0x38] sm:$0xff]  }
 0x6ef   : > { %v1265_v29 = vadd.f32 %v2063_v24, %v1264_v28  ;;  %v2277_v30 = vpop.f32.mrb[27].mxu1  ;;  %2292 = vmatprep.subr.bf16.mxu0 %v2425_v1 }
 0x6f1   : > { %v1335_v31 = vpack.c.bf16 %v1265_v29, %v1262_v26  ;;  %2283 = vmatmul.mubr.msk.bf16.vlgmr.msra.gmra.mrb[28].mxu0 %vm414_vm1, %v2531_v7  ;;  %v2377_v26 = vld [vmem:[%s2829_s1 + $0x30] sm:$0xff]  }
 0x6f2   : > { %2294 = vmatprep.mubr.msk.bf16.mxu0 %vm2426_vm0, %v2425_v1 }
 0x6f3   : > { %v1340_v32 = vsel %vm589_vm2, %v1335_v31, 0  ;;  %v2375_v31 = vld [vmem:[%s2830_s2 + $0x30] sm:$0xff]  }
 0x6f4   : > { %2287 = vmatpush3.bf16.xpose.msra.mxu1 %v1340_v32 }
 0x6f5   : > { %2298 = vmatprep.subr.bf16.mxu1 %v2425_v1 }
 0x7b4   : > { %v1082_v33 = vpop.f32.mrb[20].mxu0 }
 0x7b5   : > { %v2692_v34 = vadd.f32 %v1129_v20, %v1082_v33  ;;  %v2254_v35 = vpop.f32.mrb[21].mxu0 }
 0x7b6   : > { %v1085_v36 = vpop.f32.mrb[22].mxu0  ;;  %v2376_v35 = vld [vmem:[%s2830_s2 + $0x38] sm:$0xff]  }
 0x7b7   : > { %v2694_v37 = vadd.f32 %v1132_v22, %v1085_v36  ;;  %v2255_v38 = vpop.f32.mrb[23].mxu0  ;;  %v2085_v36 = vld [vmem:[%s2832_s4 + $0x3] ss:$0 sm:$0xff] }
 0x7bc   : > { %v1195_v40 = vpop.f32.mrb[24].mxu0 }
 0x7bd   : > { %v2268_v41 = vpop.f32.mrb[25].mxu0  ;;  %v1196_v43 = vadd.f32 %v2054_v39, %v1195_v40 }
 0x7be   : > { %v1198_v42 = vpop.f32.mrb[26].mxu0 }
 0x7bf   : > { %v1199_v44 = vadd.f32 %v2054_v39, %v1198_v42  ;;  %v2269_v45 = vpop.f32.mrb[27].mxu0 }
 0x7c1   : > { %v1334_v46 = vpack.c.bf16 %v1199_v44, %v1196_v43 }
 0x7c3   : > { %2289 = vmatmul.mubr.msk.bf16.vlgmr.msra.gmra.mrb[28].mxu1 %vm589_vm2, %v1334_v46 }
 0x7c4   : > { %2300 = vmatprep.mubr.msk.bf16.mxu1 %vm2426_vm0, %v2425_v1  ;;  %v1327_v58 = vpop.f32.mrb[28].mxu0  ;;  %2299 = vmatpush3.bf16.msra.mxu1 %v1463_v18 }
 0x7c5   : > { %v2284_v59 = vpop.f32.mrb[29].mxu0  ;;  %v1328_v11 = vadd.f32 %v2072_v10, %v1327_v58  ;;  %2312 = vmatprep.subr.bf16.mxu1 %v2425_v1 }
 0x7c6   : > { %v1330_v12 = vpop.f32.mrb[30].mxu0 }
 0x7c7   : > { %v2285_v13 = vpop.f32.mrb[31].mxu0  ;;  %v1331_v14 = vadd.f32 %v2072_v10, %v1330_v12 }
 0x7c9   : > { %v1408_v15 = vpack.c.bf16 %v1331_v14, %v1328_v11 }
 0x7cb   : > { %v1413_v16 = vand.u32 %v1408_v15, %v2572_v55 }
 0x7cd   : > { %2293 = vmatpush3.bf16.msra.mxu0 %v1413_v16 }
 0x7ce   : > { %2304 = vmatprep.subr.bf16.mxu0 %v2425_v1 }
 0x896   : > { %v1376_v49 = vpop.f32.mrb[28].mxu1 }
 0x897   : > { %v1383_v50 = vmul.f32 0.35355338, %v1376_v49  ;;  %v2290_v51 = vpop.f32.mrb[29].mxu1 }
 0x898   : > { %v1379_v52 = vpop.f32.mrb[30].mxu1  ;;  %v2094_v51 = vld [vmem:[%s2833_s5 + $0x3] ss:$0 sm:$0xff] }
 0x899   : > { %v1384_v53 = vmul.f32 0.35355338, %v1379_v52  ;;  %v2291_v54 = vpop.f32.mrb[31].mxu1  ;;  %v1385_v56 = vsel %vm639_vm3, %v1383_v50, -inf }
 0x89a   : > { %1386 = vmax.xlane.f32.xlu0 %v1385_v56 }
 0x89b   : > { %v1388_v57 = vsel %vm643_vm4, %v1384_v53, -inf }
 0x89c   : > { %1389 = vmax.xlane.f32.xlu1 %v1388_v57 }
 0x927   : > { %v1387_v60 = vpop.xlane.xlu0 %1386 }
 0x928   : > { %v1391_v61 = vsub.f32 %v1383_v50, %v1387_v60  ;;  %v2380_v60 = vld [vmem:[%s2831_s3 + $0x38] sm:$0xff]  }
 0x929   : > { %v1390_v62 = vpop.xlane.xlu1 %1389 }
 0x92a   : > { %v1393_v63 = vmul.f32 1.442695, %v1391_v61  ;;  %v1392_v0 = vsub.f32 %v1384_v53, %v1390_v62 }
 0x92c   : > { %2397 = vpow2.f32 %v1393_v63  ;;  %v1395_v2 = vmul.f32 1.442695, %v1392_v0 }
 0x92e   : > { %2399 = vpow2.f32 %v1395_v2 }
 0x936   : > { %v2398_v3 = vpop.eup %2397 }
 0x937   : > { %v1397_v4 = vsel %vm639_vm3, %v2398_v3, 0.0 }
 0x938   : > { %v2400_v8 = vpop.eup %2399  ;;  %1398 = vadd.xlane.f32.xlu0 %v1397_v4 }
 0x939   : > { %v1400_v9 = vsel %vm643_vm4, %v2400_v8, 0.0 }
 0x93a   : > { %1401 = vadd.xlane.f32.xlu1 %v1400_v9 }
 0x9c5   : > { %v1399_v19 = vpop.xlane.xlu0 %1398 }
 0x9c6   : > { %2401 = vrcp.f32 %v1399_v19  ;;  %v2103_v19 = vld [vmem:[%s2834_s6 + $0x3] ss:$0 sm:$0xff] }
 0x9c7   : > { %v1402_v20 = vpop.xlane.xlu1 %1401 }
 0x9c8   : > { %2403 = vrcp.f32 %v1402_v20 }
 0x9d0   : > { %v2402_v21 = vpop.eup %2401 }
 0x9d1   : > { %v1405_v23 = vmul.f32 %v2402_v21, %v2398_v3 }
 0x9d2   : > { %v2404_v22 = vpop.eup %2403 }
 0x9d3   : > { %v1406_v24 = vmul.f32 %v2404_v22, %v2400_v8 }
 0x9d5   : > { %v1407_v25 = vpack.c.bf16 %v1406_v24, %v1405_v23 }
 0x9d7   : > { %2295 = vmatmul.mubr.msk.bf16.vlgmr.msra.gmra.mrb[32].mxu0 %vm639_vm3, %v1407_v25 }
 0x9d8   : > { %2308 = vmatprep.mubr.msk.bf16.mxu0 %vm2426_vm0, %v2425_v1  ;;  %2305 = vmatpush3.bf16.msra.mxu0 %v2377_v26  ;;  %v2109_v26 = vld [vmem:[%s2835_s7 + $0xc] sm:$0xf] }
 0x9d9   : > { %2306 = vmatprep.subr.bf16.mxu0 %v2425_v1 }
 0x9dc   : > { %2307 = vmatpush3.bf16.msra.mxu0 %v2378_v27  ;;  %v1835_v27 = vsel %vm1044_vm7, %v2109_v26, 0 }
 0x9dd   : > { %2320 = vmatprep.subr.bf16.mxu0 %v2425_v1 }
 0x9df   : > { %2309 = vmatmul.mubr.msk.bf16.vlgmr.msra.gmra.mrb[36].mxu0 %vm414_vm1, %v2531_v7 }
 0x9e0   : > { %2324 = vmatprep.mubr.msk.bf16.mxu0 %vm2426_vm0, %v2425_v1 }
 0xaaa   : > { %v1449_v28 = vpop.f32.mrb[32].mxu0 }
 0xaab   : > { %v2296_v29 = vpop.f32.mrb[33].mxu0 }
 0xaac   : > { %v1452_v30 = vpop.f32.mrb[34].mxu0 }
 0xaad   : > { %v1456_v32 = vpack.c.bf16 %v1452_v30, %v1449_v28  ;;  %v2297_v33 = vpop.f32.mrb[35].mxu0 }
 0xaaf   : > { %2301 = vmatmul.mubr.msk.bf16.vlgmr.msra.gmra.mrb[32].mxu1 %vm589_vm2, %v1456_v32 }
 0xab0   : > { %2313 = vmatpush3.bf16.msra.mxu1 %v2375_v31  ;;  %2316 = vmatprep.mubr.msk.bf16.mxu1 %vm2426_vm0, %v2425_v1 }
 0xab1   : > { %2314 = vmatprep.subr.bf16.mxu1 %v2425_v1 }
 0xab2   : > { %v1567_v38 = vpop.f32.mrb[36].mxu0 }
 0xab3   : > { %v1568_v39 = vadd.f32 %v2085_v36, %v1567_v38  ;;  %v2310_v40 = vpop.f32.mrb[37].mxu0 }
 0xab4   : > { %2315 = vmatpush3.bf16.msra.mxu1 %v2376_v35  ;;  %v1570_v41 = vpop.f32.mrb[38].mxu0 }
 0xab5   : > { %2328 = vmatprep.subr.bf16.mxu1 %v2425_v1  ;;  %v1571_v42 = vadd.f32 %v2085_v36, %v1570_v41  ;;  %v2311_v43 = vpop.f32.mrb[39].mxu0 }
 0xab7   : > { %2317 = vmatmul.mubr.msk.bf16.vlgmr.msra.gmra.mrb[36].mxu1 %vm414_vm1, %v2531_v7  ;;  %v1706_v44 = vpack.c.bf16 %v1571_v42, %v1568_v39 }
 0xab8   : > { %2330 = vmatprep.mubr.msk.bf16.mxu1 %vm2426_vm0, %v2425_v1 }
 0xb82   : > { %v1499_v45 = vpop.f32.mrb[32].mxu1 }
 0xb83   : > { %v2762_v46 = vadd.f32 %v1499_v45, %v2692_v34  ;;  %v2302_v47 = vpop.f32.mrb[33].mxu1  ;;  %v2111_v45 = vld [vmem:[%s2836_s8] ss:$0 sm:$0xff] }
 0xb84   : > { %v1502_v48 = vpop.f32.mrb[34].mxu1 }
 0xb85   : > { %v2765_v49 = vadd.f32 %v1502_v48, %v2694_v37  ;;  %v2303_v50 = vpop.f32.mrb[35].mxu1  ;;  %v2379_v37 = vld [vmem:[%s2831_s3 + $0x30] sm:$0xff]  }
 0xb86   : > { %2321 = vmatpush3.bf16.msra.mxu0 %v2379_v37 }
 0xb87   : > { %2322 = vmatprep.subr.bf16.mxu0 %v2425_v1 }
 0xb8a   : > { %v1633_v52 = vpop.f32.mrb[36].mxu1  ;;  %2323 = vmatpush3.bf16.msra.mxu0 %v2380_v60 }
 0xb8b   : > { %v2318_v53 = vpop.f32.mrb[37].mxu1  ;;  %v1634_v56 = vadd.f32 %v2094_v51, %v1633_v52  ;;  %2334 = vmatprep.subr.bf16.mxu0 %v2425_v1 }
 0xb8c   : > { %v1636_v54 = vpop.f32.mrb[38].mxu1 }
 0xb8d   : > { %v1637_v57 = vadd.f32 %v2094_v51, %v1636_v54  ;;  %v2319_v58 = vpop.f32.mrb[39].mxu1  ;;  %2325 = vmatmul.mubr.msk.bf16.vlgmr.msra.gmra.mrb[40].mxu0 %vm414_vm1, %v2531_v7 }
 0xb8e   : > { %2336 = vmatprep.mubr.msk.bf16.mxu0 %vm2426_vm0, %v2425_v1 }
 0xb8f   : > { %v1707_v59 = vpack.c.bf16 %v1637_v57, %v1634_v56 }
 0xb91   : > { %v1712_v34 = vsel %vm589_vm2, %v1707_v59, 0 }
 0xb92   : > { %2329 = vmatpush3.bf16.xpose.msra.mxu1 %v1712_v34 }
 0xb93   : > { %2340 = vmatprep.subr.bf16.mxu1 %v2425_v1 }
 0xb99   : > { %2331 = vmatmul.mubr.msk.bf16.vlgmr.msra.gmra.mrb[40].mxu1 %vm589_vm2, %v1706_v44 }
 0xb9a   : > { %2342 = vmatprep.mubr.msk.bf16.mxu1 %vm2426_vm0, %v2425_v1  ;;  %2341 = vmatpush3.bf16.msra.mxu1 %v1835_v27 }
 0xc60   : > { %v1699_v9 = vpop.f32.mrb[40].mxu0 }
 0xc61   : > { %v2326_v10 = vpop.f32.mrb[41].mxu0  ;;  %v1700_v20 = vadd.f32 %v2103_v19, %v1699_v9 }
 0xc62   : > { %v1702_v21 = vpop.f32.mrb[42].mxu0 }
 0xc63   : > { %v2327_v22 = vpop.f32.mrb[43].mxu0  ;;  %v1703_v23 = vadd.f32 %v2103_v19, %v1702_v21 }
 0xc65   : > { %v1780_v24 = vpack.c.bf16 %v1703_v23, %v1700_v20 }
 0xc67   : > { %v1785_v25 = vand.u32 %v1780_v24, %v2572_v55 }
 0xc69   : > { %2335 = vmatpush3.bf16.msra.mxu0 %v1785_v25 }
 0xc6c   : > { %v1748_v61 = vpop.f32.mrb[40].mxu1 }
 0xc6d   : > { %v1755_v62 = vmul.f32 0.35355338, %v1748_v61  ;;  %v2332_v63 = vpop.f32.mrb[41].mxu1 }
 0xc6e   : > { %v1751_v0 = vpop.f32.mrb[42].mxu1 }
 0xc6f   : > { %v1756_v2 = vmul.f32 0.35355338, %v1751_v0  ;;  %v2333_v3 = vpop.f32.mrb[43].mxu1  ;;  %v1757_v4 = vsel %vm639_vm3, %v1755_v62, -inf }
 0xc70   : > { %1758 = vmax.xlane.f32.xlu0 %v1757_v4 }
 0xc71   : > { %v1760_v8 = vsel %vm643_vm4, %v1756_v2, -inf }
 0xc72   : > { %1761 = vmax.xlane.f32.xlu1 %v1760_v8  ;;  %v2112_v8 = vld [vmem:[%s2837_s9] ss:$0 sm:$0xff] }
 0xcfd   : > { %v1759_v11 = vpop.xlane.xlu0 %1758 }
 0xcfe   : > { %v1763_v12 = vsub.f32 %v1755_v62, %v1759_v11  ;;  %v2113_v11 = vld [vmem:[%s2838_s10] ss:$0 sm:$0xff] }
 0xcff   : > { %v1762_v7 = vpop.xlane.xlu1 %1761 }
 0xd00   : > { %v1765_v13 = vmul.f32 1.442695, %v1763_v12  ;;  %v1764_v14 = vsub.f32 %v1756_v2, %v1762_v7 }
 0xd02   : > { %2405 = vpow2.f32 %v1765_v13  ;;  %v1767_v1 = vmul.f32 1.442695, %v1764_v14 }
 0xd04   : > { %2407 = vpow2.f32 %v1767_v1 }
 0xd0c   : > { %v2406_v15 = vpop.eup %2405 }
 0xd0d   : > { %v1769_v16 = vsel %vm639_vm3, %v2406_v15, 0.0 }
 0xd0e   : > { %v2408_v17 = vpop.eup %2407  ;;  %1770 = vadd.xlane.f32.xlu0 %v1769_v16 }
 0xd0f   : > { %v1772_v18 = vsel %vm643_vm4, %v2408_v17, 0.0 }
 0xd10   : > { %1773 = vadd.xlane.f32.xlu1 %v1772_v18 }
 0xd9b   : > { %v1771_v28 = vpop.xlane.xlu0 %1770 }
 0xd9c   : > { %2409 = vrcp.f32 %v1771_v28 }
 0xd9d   : > { %v1774_v29 = vpop.xlane.xlu1 %1773 }
 0xd9e   : > { %2411 = vrcp.f32 %v1774_v29 }
 0xda6   : > { %v2410_v30 = vpop.eup %2409 }
 0xda7   : > { %v1777_v32 = vmul.f32 %v2410_v30, %v2406_v15 }
 0xda8   : > { %v2412_v31 = vpop.eup %2411 }
 0xda9   : > { %v1778_v33 = vmul.f32 %v2412_v31, %v2408_v17 }
 0xdab   : > { %v1779_v35 = vpack.c.bf16 %v1778_v33, %v1777_v32 }
 0xdad   : > { %2337 = vmatmul.mubr.msk.bf16.vlgmr.msra.gmra.mrb[44].mxu0 %vm639_vm3, %v1779_v35 }
 0xe80   : > { %v1821_v55 = vpop.f32.mrb[44].mxu0 }
 0xe81   : > { %v2338_v36 = vpop.f32.mrb[45].mxu0 }
 0xe82   : > { %v1824_v38 = vpop.f32.mrb[46].mxu0 }
 0xe83   : > { %v1828_v39 = vpack.c.bf16 %v1824_v38, %v1821_v55  ;;  %v2339_v40 = vpop.f32.mrb[47].mxu0 }
 0xe85   : > { %2343 = vmatmul.mubr.msk.bf16.vlgmr.msra.gmra.mrb[44].mxu1 %vm589_vm2, %v1828_v39 }
 0xf58   : > { %v1871_v41 = vpop.f32.mrb[44].mxu1 }
 0xf59   : > { %v1878_v42 = vadd.f32 %v1871_v41, %v2762_v46  ;;  %v2344_v43 = vpop.f32.mrb[45].mxu1 }
 0xf5a   : > { %v1874_v44 = vpop.f32.mrb[46].mxu1 }
 0xf5b   : > { %v1880_v47 = vadd.f32 %v1878_v42, %v2525_v5  ;;  %v1879_v48 = vadd.f32 %v1874_v44, %v2765_v49  ;;  %v2345_v50 = vpop.f32.mrb[47].mxu1 }
 0xf5d   : > { %v1881_v51 = vadd.f32 %v1879_v48, %v2527_v6  ;;  %v1889_v52 = vadd.f32 %v2111_v45, %v1880_v47 }
 0xf5f   : > { %v1891_v53 = vsel %vm414_vm1, %v1889_v52, 0.0  ;;  %v1890_v54 = vadd.f32 %v2111_v45, %v1881_v51 }
 0xf60   : > { %1892 = vadd.xlane.f32.xlu0 %v1891_v53 }
 0xf61   : > { %v1895_v46 = vsel %vm1894_vm8, %v1890_v54, 0.0 }
 0xf62   : > { %1896 = vadd.xlane.f32.xlu1 %v1895_v46 }
 0xfed   : > { %v1893_v56 = vpop.xlane.xlu0 %1892 }
 0xfee   : > { %v1899_v57 = vmul.f32 0.03125, %v1893_v56 }
 0xfef   : > { %v1897_v58 = vpop.xlane.xlu1 %1896 }
 0xff0   : > { %v1901_v59 = vsub.f32 %v1889_v52, %v1899_v57  ;;  %v1900_v34 = vmul.f32 0.03125, %v1897_v58 }
 0xff2   : > { %v1902_v5 = vsub.f32 %v1890_v54, %v1900_v34  ;;  %v1903_v37 = vmul.f32 %v1901_v59, %v1901_v59 }
 0xff4   : > { %v1905_v49 = vsel %vm414_vm1, %v1903_v37, 0.0  ;;  %v1904_v60 = vmul.f32 %v1902_v5, %v1902_v5 }
 0xff5   : > { %1906 = vadd.xlane.f32.xlu0 %v1905_v49 }
 0xff6   : > { %v1908_v6 = vsel %vm1894_vm8, %v1904_v60, 0.0 }
 0xff7   : > { %1909 = vadd.xlane.f32.xlu1 %v1908_v6 }
0x1082   : > { %v1907_v61 = vpop.xlane.xlu0 %1906 }
0x1083   : > { %v1911_v62 = vmul.f32 0.03125, %v1907_v61 }
0x1084   : > { %v1910_v63 = vpop.xlane.xlu1 %1909 }
0x1085   : > { %v1913_v0 = vadd.f32 1e-05, %v1911_v62  ;;  %v1912_v2 = vmul.f32 0.03125, %v1910_v63 }
0x1087   : > { %2413 = vrsqrt.f32 %v1913_v0  ;;  %v1914_v3 = vadd.f32 1e-05, %v1912_v2 }
0x1089   : > { %2415 = vrsqrt.f32 %v1914_v3 }
0x1091   : > { %v2414_v4 = vpop.eup %2413 }
0x1092   : > { %v1917_v9 = vmul.f32 %v2414_v4, %v1901_v59 }
0x1093   : > { %v2416_v10 = vpop.eup %2415 }
0x1094   : > { %v1926_v12 = vmul.f32 %v2112_v8, %v1917_v9  ;;  %v1918_v7 = vmul.f32 %v2416_v10, %v1902_v5 }
0x1096   : > { %v1935_v13 = vadd.f32 %v2113_v11, %v1926_v12  ;;  %v1927_v14 = vmul.f32 %v2112_v8, %v1918_v7 }
0x1098   : > { %1937 = vst.msk [vmem:[%s386_s12] sm:$0xff] %vm414_vm1, %v1935_v13  ;;  %v1936_v1 = vadd.f32 %v2113_v11, %v1927_v14 }
0x109a   : > { %1938 = vst.msk [vmem:[%s386_s12 + $0x8] sm:$0x7] %vm1894_vm8, %v1936_v1 }
0x109b PF: > { %s21_s17 = sadd.s32 1, %s2423_s17  }
0x109c   : > { %p18_p4 = scmp.ge.s32.totalorder %s21_s17, 4  }
0x109e   :  { %20 = sbr.rel (!%p18_p4) target bundleno = 1 (0x1), region = 115 }

</bundles_post_ra>
